<compile_context>
chip_gen: v6e
topology: v6e:2x2x1
jax: 0.10.0
libtpu: 0.0.40
codegen_flags: <defaults>
</compile_context>

<pallas_src>
import functools

import jax
import jax.numpy as jnp
from jax import lax
from jax.experimental import pallas as pl
from jax.experimental.pallas import tpu as pltpu


def _round_up(x, m):
    return ((x + m - 1) // m) * m


def _pick_tile(m, tile_max):
    # Keep >= 2 tiles along the "parallel" axis (v7x has 2 TensorCores);
    # 16-aligned so bf16 blocks are sublane-friendly.
    return max(16, min(tile_max, _round_up(-(-m // 2), 16)))


# ---------------------------------------------------------------------------
# Fused conv (+ optional mask / ReLU / fused 1x1 fconv) as one matmul kernel
# ---------------------------------------------------------------------------
def _conv_matmul(x_cols, w_mat, bias, mask_flat=None, *, apply_relu,
                 out_dtype, compute_dtype, fconv_w=None, fconv_b=None,
                 tm_max=512):
    """y = [relu]([mask](x_cols @ w_mat + bias)) [@ fconv_w + fconv_b].

    x_cols : (M, K)     im2col'ed activations (K = 9*Cin: taps folded into K)
    w_mat  : (K, Cmid)  weights, already in (K, N) layout for the MXU
    bias   : (Cmid,)
    mask   : (M, 1) of {0,1} or None
    fconv_w: (Cmid, Cout) or None  -> fused 1x1-conv epilogue
    """
    M, K = x_cols.shape
    Cmid = w_mat.shape[-1]
    fused = fconv_w is not None
    has_mask = mask_flat is not None
    Cout = fconv_w.shape[-1] if fused else Cmid

    # Pad the contraction dim to a sublane-friendly multiple (zeros are inert).
    Kp = _round_up(K, 16)
    if Kp != K:
        x_cols = jnp.pad(x_cols, ((0, 0), (0, Kp - K)))
        w_mat = jnp.pad(w_mat, ((0, Kp - K), (0, 0)))

    tm = _pick_tile(M, tm_max)
    Mp = _round_up(M, tm)
    if Mp != M:
        x_cols = jnp.pad(x_cols, ((0, Mp - M), (0, 0)))
        if has_mask:
            mask_flat = jnp.pad(mask_flat, ((0, Mp - M), (0, 0)))

    x_cols = x_cols.astype(compute_dtype)
    w_mat = w_mat.astype(compute_dtype)
    bias2 = bias.reshape(1, Cmid).astype(jnp.float32)

    inputs = [x_cols, w_mat, bias2]
    in_specs = [
        pl.BlockSpec((tm, Kp), lambda m: (m, 0)),
        pl.BlockSpec((Kp, Cmid), lambda m: (0, 0)),     # weights stay resident
        pl.BlockSpec((1, Cmid), lambda m: (0, 0)),
    ]
    if fused:
        inputs += [fconv_w.astype(compute_dtype),
                   fconv_b.reshape(1, Cout).astype(jnp.float32)]
        in_specs += [pl.BlockSpec((Cmid, Cout), lambda m: (0, 0)),
                     pl.BlockSpec((1, Cout), lambda m: (0, 0))]
    if has_mask:
        inputs.append(mask_flat.astype(jnp.float32))
        in_specs.append(pl.BlockSpec((tm, 1), lambda m: (m, 0)))

    def kernel(*refs):
        if fused and has_mask:
            x_ref, w_ref, b_ref, fw_ref, fb_ref, m_ref, o_ref = refs
        elif fused:
            x_ref, w_ref, b_ref, fw_ref, fb_ref, o_ref = refs
            m_ref = None
        elif has_mask:
            x_ref, w_ref, b_ref, m_ref, o_ref = refs
            fw_ref = fb_ref = None
        else:
            x_ref, w_ref, b_ref, o_ref = refs
            fw_ref = fb_ref = m_ref = None

        y = jnp.dot(x_ref[...], w_ref[...], preferred_element_type=jnp.float32)
        y = y + b_ref[...]
        if has_mask:
            # torch: sim.masked_fill((1 - mask).bool(), 0.0)  (binary mask)
            y = jnp.where(m_ref[...] != 0.0, y, 0.0)
        if apply_relu:
            y = jnp.maximum(y, 0.0)
        if fused:
            y = jnp.dot(y.astype(compute_dtype), fw_ref[...],
                        preferred_element_type=jnp.float32) + fb_ref[...]
        o_ref[...] = y.astype(o_ref.dtype)

    flops = 2 * Mp * Kp * Cmid + (2 * Mp * Cmid * Cout if fused else 0)
    bytes_accessed = int(x_cols.size * x_cols.dtype.itemsize
                         + w_mat.size * w_mat.dtype.itemsize
                         + Mp * Cout * jnp.dtype(out_dtype).itemsize
                         + (Mp * 4 if has_mask else 0))

    out = pl.pallas_call(
        kernel,
        out_shape=jax.ShapeDtypeStruct((Mp, Cout), out_dtype),
        grid_spec=pltpu.PrefetchScalarGridSpec(
            num_scalar_prefetch=0,
            grid=(Mp // tm,),
            in_specs=in_specs,
            out_specs=pl.BlockSpec((tm, Cout), lambda m: (m, 0)),
        ),
        compiler_params=pltpu.CompilerParams(
            dimension_semantics=("parallel",)),
        cost_estimate=pl.CostEstimate(flops=flops, transcendentals=0,
                                      bytes_accessed=bytes_accessed),
    )(*inputs)
    return out[:M]


def _im2col_3x3(x_nhwc):
    """(N,H,W,C) -> (N*H*W, 9*C): zero-padded 3x3 taps folded into the matmul
    K dim.  Pure layout glue, done once by XLA per layer."""
    N, H, W, C = x_nhwc.shape
    xp = jnp.pad(x_nhwc, ((0, 0), (1, 1), (1, 1), (0, 0)))
    cols = [xp[:, dy:dy + H, dx:dx + W, :]
            for dy in range(3) for dx in range(3)]
    return jnp.concatenate(cols, axis=-1).reshape(N * H * W, 9 * C)


def _conv3x3(x, w, b, mask, *, apply_relu, out_dtype, compute_dtype,
             fconv_w=None, fconv_b=None):
    N, H, W, Cin = x.shape
    x_cols = _im2col_3x3(x)
    w_mat = w.reshape(9 * Cin, -1)
    mask_flat = None if mask is None else mask.reshape(N * H * W, 1)
    fw = None
    if fconv_w is not None:
        fw = fconv_w.reshape(fconv_w.shape[-2], fconv_w.shape[-1])
    y = _conv_matmul(x_cols, w_mat, b, mask_flat, apply_relu=apply_relu,
                     out_dtype=out_dtype, compute_dtype=compute_dtype,
                     fconv_w=fw, fconv_b=fconv_b)
    return y.reshape(N, H, W, y.shape[-1])


# ---------------------------------------------------------------------------
# 2x2 / stride-2 max pool, straight from NHWC (free reshapes only)
# ---------------------------------------------------------------------------
def _maxpool2x2(x):
    N, H, W, C = x.shape
    H2, W2 = H // 2, W // 2
    NP = N * H2
    xv = x.reshape(NP, 2, W2, 2 * C)            # free row-major view
    bp = max(8, min(256, _round_up(-(-NP // 2), 8)))
    Pp = _round_up(NP, bp)
    if Pp != NP:
        xv = jnp.pad(xv, ((0, Pp - NP), (0, 0), (0, 0), (0, 0)))

    def kernel(x_ref, o_ref):
        v = jnp.maximum(x_ref[:, 0], x_ref[:, 1])         # row pairs (bp,W2,2C)
        o_ref[...] = jnp.maximum(v[..., :C], v[..., C:])  # col pairs (bp,W2,C)

    y = pl.pallas_call(
        kernel,
        out_shape=jax.ShapeDtypeStruct((Pp, W2, C), x.dtype),
        grid_spec=pl.GridSpec(
            grid=(Pp // bp,),
            in_specs=[pl.BlockSpec((bp, 2, W2, 2 * C), lambda i: (i, 0, 0, 0))],
            out_specs=pl.BlockSpec((bp, W2, C), lambda i: (i, 0, 0)),
        ),
        compiler_params=pltpu.CompilerParams(
            dimension_semantics=("parallel",)),
    )(xv)
    return y[:NP].reshape(N, H2, W2, C)


# ---------------------------------------------------------------------------
# VideoComperator forward (Pallas) + params
# ---------------------------------------------------------------------------
def _xavier_uniform(key, shape, fan_in, fan_out):
    limit = (6.0 / (fan_in + fan_out)) ** 0.5
    return jax.random.uniform(key, shape, jnp.float32, -limit, limit)


def init_video_comperator_params(key, in_channels=1, out_channels=1):
    k1, k2, k3, k4 = jax.random.split(key, 4)
    return {
        "w1": _xavier_uniform(k1, (3, 3, in_channels, 32), in_channels * 9, 32 * 9),
        "b1": jnp.zeros((32,), jnp.float32),
        "w2": _xavier_uniform(k2, (3, 3, 32, 64), 32 * 9, 64 * 9),
        "b2": jnp.zeros((64,), jnp.float32),
        "w3": _xavier_uniform(k3, (3, 3, 64, 128), 64 * 9, 128 * 9),
        "b3": jnp.zeros((128,), jnp.float32),
        "wf": _xavier_uniform(k4, (1, 1, 128, out_channels), 128, out_channels),
        "bf": jnp.zeros((out_channels,), jnp.float32),
    }


def video_comperator_forward(params, sim_matrix, mask=None, *,
                             compute_dtype=jnp.bfloat16):
    """Pallas TPU forward of VideoComperator.  Torch layouts on the interface:
    sim_matrix (N, H, W) or (N, C, H, W); mask (N, H, W) of {0,1} or None."""
    if sim_matrix.ndim == 3:
        x = sim_matrix[:, None]                        # (N, 1, H, W)
    elif sim_matrix.ndim == 4:
        x = sim_matrix
    else:
        raise ValueError(
            "Input tensor to VideoComperator have to be 3- or 4-dimensional")
    N, _, H, W = x.shape
    # TODO(synk): odd H/W (floor-mode MaxPool2d) not handled; use multiples of 4.
    assert H % 4 == 0 and W % 4 == 0

    x = jnp.transpose(x, (0, 2, 3, 1)).astype(compute_dtype)   # NHWC
    m = None
    if mask is not None:
        assert mask.shape[-2:] == sim_matrix.shape[-2:], (
            "Mask tensor must match similarity matrix in the last two dims")
        m = mask.astype(jnp.float32).reshape(N, H, W, 1)

    # conv1 -> mask -> relu -> pool  (bf16 activations between layers)
    y = _conv3x3(x, params["w1"], params["b1"], m, apply_relu=True,
                 out_dtype=compute_dtype, compute_dtype=compute_dtype)
    y = _maxpool2x2(y)
    if m is not None:
        m = _maxpool2x2(m)

    # conv2 -> mask -> relu -> pool
    y = _conv3x3(y, params["w2"], params["b2"], m, apply_relu=True,
                 out_dtype=compute_dtype, compute_dtype=compute_dtype)
    y = _maxpool2x2(y)
    if m is not None:
        m = _maxpool2x2(m)

    # conv3 -> mask -> relu -> fconv, all fused in one kernel (the 128-channel
    # layer-3 activation never touches HBM); final output in f32.
    y = _conv3x3(y, params["w3"], params["b3"], m, apply_relu=True,
                 out_dtype=jnp.float32, compute_dtype=compute_dtype,
                 fconv_w=params["wf"], fconv_b=params["bf"])

    out = jnp.transpose(y, (0, 3, 1, 2))               # NCHW (N, out_ch, H/4, W/4)
    if out.shape[1] == 1:
        out = out[:, 0]                                # torch .squeeze(1)
    mask_out = m[..., 0] if m is not None else None
    return out, mask_out


# ---------------------------------------------------------------------------
# Pure-JAX reference (same semantics as the torch module), for verification
# ---------------------------------------------------------------------------
def reference_forward(params, sim_matrix, mask=None):
    x = sim_matrix[:, None] if sim_matrix.ndim == 3 else sim_matrix
    N, _, H, W = x.shape
    x = jnp.transpose(x, (0, 2, 3, 1)).astype(jnp.float32)
    m = mask.astype(jnp.float32).reshape(N, H, W, 1) if mask is not None else None

    def conv(x, w, b):
        y = lax.conv_general_dilated(
            x, w, (1, 1), ((1, 1), (1, 1)),
            dimension_numbers=("NHWC", "HWIO", "NHWC"),
            precision=lax.Precision.HIGHEST)
        return y + b

    def pool(x):
        n, h, w, c = x.shape
        return x.reshape(n, h // 2, 2, w // 2, 2, c).max(axis=(2, 4))

    def apply_mask(y, m):
        return y if m is None else jnp.where(m != 0.0, y, 0.0)

    y = jax.nn.relu(apply_mask(conv(x, params["w1"], params["b1"]), m))
    y = pool(y)
    if m is not None:
        m = pool(m)
    y = jax.nn.relu(apply_mask(conv(y, params["w2"], params["b2"]), m))
    y = pool(y)
    if m is not None:
        m = pool(m)
    y = jax.nn.relu(apply_mask(conv(y, params["w3"], params["b3"]), m))
    wf = params["wf"].reshape(128, -1)
    y = jnp.einsum("nhwc,cd->nhwd", y, wf,
                   precision=lax.Precision.HIGHEST) + params["bf"]
    out = jnp.transpose(y, (0, 3, 1, 2))
    if out.shape[1] == 1:
        out = out[:, 0]
    return out, (m[..., 0] if m is not None else None)


if __name__ == "__main__":
    key = jax.random.PRNGKey(0)
    kp, kx, km = jax.random.split(key, 3)

    N, H, W = 2, 16, 16
    params = init_video_comperator_params(kp, in_channels=1, out_channels=1)
    sim = jax.random.normal(kx, (N, H, W), dtype=jnp.float32)
    mask = (jax.random.uniform(km, (N, H, W)) > 0.2).astype(jnp.float32)

    ref_out, _ = reference_forward(params, sim, None)
    ref_out_m, ref_mask_m = reference_forward(params, sim, mask)

    fwd_bf16 = jax.jit(functools.partial(video_comperator_forward, params))
    fwd_f32 = jax.jit(functools.partial(video_comperator_forward, params,
                                        compute_dtype=jnp.float32))

    # ---- f32 compute path, tight tolerance ----------------------------------
    out32, m32 = fwd_f32(sim, None)
    out32 = jax.block_until_ready(out32)
    assert out32.shape == (N, H // 4, W // 4), out32.shape
    assert m32 is None
    assert jnp.allclose(out32, ref_out, atol=5e-2, rtol=5e-2), "f32 mismatch (no mask)"

    out32m, mask32m = fwd_f32(sim, mask)
    out32m = jax.block_until_ready(out32m)
    assert mask32m.shape == (N, H // 4, W // 4), mask32m.shape
    assert jnp.allclose(out32m, ref_out_m, atol=5e-2, rtol=5e-2), "f32 mismatch (mask)"
    assert jnp.allclose(mask32m, ref_mask_m), "mask pooling mismatch (f32)"

    # ---- default bf16 compute path, loose tolerance --------------------------
    outbf, mbf = fwd_bf16(sim, None)
    outbf = jax.block_until_ready(outbf)
    assert outbf.shape == ref_out.shape
    assert mbf is None
    assert bool(jnp.all(jnp.isfinite(outbf)))
    assert jnp.allclose(outbf, ref_out, atol=1e-1, rtol=1e-1), "bf16 mismatch (no mask)"

    outbfm, maskbfm = fwd_bf16(sim, mask)
    outbfm = jax.block_until_ready(outbfm)
    assert jnp.allclose(outbfm, ref_out_m, atol=1e-1, rtol=1e-1), "bf16 mismatch (mask)"
    assert jnp.allclose(maskbfm, ref_mask_m), "mask pooling mismatch (bf16)"

    print("KERNEL_OK")
</pallas_src>

<mosaic_0001>
module attributes {stable_mosaic.version = 11 : i64} {
  func.func @kernel(%arg0: i32, %arg1: memref<256x16xf32, #tpu.memory_space<vmem>>, %arg2: memref<16x32xf32, #tpu.memory_space<vmem>>, %arg3: memref<1x32xf32, #tpu.memory_space<vmem>>, %arg4: memref<256x32xf32, #tpu.memory_space<vmem>>) attributes {dimension_semantics = [#tpu.dimension_semantics<parallel>], iteration_bounds = array<i64: 2>, scalar_prefetch = 0 : i64, scratch_operands = 0 : i64, tpu.core_type = #tpu.core_type<tc>, window_params = [{transform_indices = @transform_0, window_bounds = array<i64: 256, 16>}, {pipeline_mode = #tpu.pipeline_mode<synchronous>, transform_indices = @transform_1, window_bounds = array<i64: 16, 32>}, {pipeline_mode = #tpu.pipeline_mode<synchronous>, transform_indices = @transform_2, window_bounds = array<i64: 1, 32>}, {transform_indices = @transform_3, window_bounds = array<i64: 256, 32>}]} {
    %c0 = arith.constant 0 : index
    %c0_0 = arith.constant 0 : index
    %0 = vector.load %arg1[%c0, %c0_0] : memref<256x16xf32, #tpu.memory_space<vmem>>, vector<256x16xf32>
    %c0_1 = arith.constant 0 : index
    %c0_2 = arith.constant 0 : index
    %1 = vector.load %arg2[%c0_1, %c0_2] : memref<16x32xf32, #tpu.memory_space<vmem>>, vector<16x32xf32>
    %cst = arith.constant dense<0.000000e+00> : vector<256x32xf32>
    %2 = tpu.matmul %0, %1, %cst {dimension_numbers = #tpu.dot_dimension_numbers<[1], [0], [0], [1], [0, 0, 1, 1], [], []>} : vector<256x16xf32>, vector<16x32xf32>, vector<256x32xf32> -> vector<256x32xf32>
    %c0_3 = arith.constant 0 : index
    %c0_4 = arith.constant 0 : index
    %3 = vector.load %arg3[%c0_3, %c0_4] : memref<1x32xf32, #tpu.memory_space<vmem>>, vector<1x32xf32>
    %4 = vector.broadcast %3 : vector<1x32xf32> to vector<256x32xf32>
    %5 = arith.addf %2, %4 : vector<256x32xf32>
    %cst_5 = arith.constant 0.000000e+00 : f32
    %6 = vector.broadcast %cst_5 : f32 to vector<256x32xf32>
    %7 = arith.maximumf %5, %6 : vector<256x32xf32>
    %c0_6 = arith.constant 0 : index
    %c0_7 = arith.constant 0 : index
    %8 = vector.load %arg4[%c0_6, %c0_7] : memref<256x32xf32, #tpu.memory_space<vmem>>, vector<256x32xf32>
    tpu.vector_store %arg4[%c0_6, %c0_7], %7 {strides = array<i32>} : memref<256x32xf32, #tpu.memory_space<vmem>>, vector<256x32xf32>,
    return
  }
  func.func @transform_0(%arg0: i32) -> (i32, i32) {
    %c0_i32 = arith.constant 0 : i32
    %c0_i32_0 = arith.constant 0 : i32
    return %arg0, %c0_i32 : i32, i32
  }
  func.func @transform_1(%arg0: i32) -> (i32, i32) {
    %c0_i32 = arith.constant 0 : i32
    %c0_i32_0 = arith.constant 0 : i32
    %c0_i32_1 = arith.constant 0 : i32
    return %c0_i32, %c0_i32_0 : i32, i32
  }
  func.func @transform_2(%arg0: i32) -> (i32, i32) {
    %c0_i32 = arith.constant 0 : i32
    %c0_i32_0 = arith.constant 0 : i32
    %c0_i32_1 = arith.constant 0 : i32
    return %c0_i32, %c0_i32_0 : i32, i32
  }
  func.func @transform_3(%arg0: i32) -> (i32, i32) {
    %c0_i32 = arith.constant 0 : i32
    %c0_i32_0 = arith.constant 0 : i32
    return %arg0, %c0_i32 : i32, i32
  }
}

module attributes {stable_mosaic.version = 11 : i64} {
  func.func @kernel(%arg0: i32, %arg1: memref<8x2x8x64xf32, #tpu.memory_space<vmem>>, %arg2: memref<8x8x32xf32, #tpu.memory_space<vmem>>) attributes {dimension_semantics = [#tpu.dimension_semantics<parallel>], iteration_bounds = array<i64: 2>, scalar_prefetch = 0 : i64, scratch_operands = 0 : i64, tpu.core_type = #tpu.core_type<tc>, window_params = [{transform_indices = @transform_0, window_bounds = array<i64: 8, 2, 8, 64>}, {transform_indices = @transform_1, window_bounds = array<i64: 8, 8, 32>}]} {
    %c0 = arith.constant 0 : index
    %c0_0 = arith.constant 0 : index
    %c0_1 = arith.constant 0 : index
    %c0_2 = arith.constant 0 : index
    %0 = vector.load %arg1[%c0, %c0_0, %c0_1, %c0_2] : memref<8x2x8x64xf32, #tpu.memory_space<vmem>>, vector<8x1x8x64xf32>
    %1 = vector.shape_cast %0 : vector<8x1x8x64xf32> to vector<8x8x64xf32>
    %c0_3 = arith.constant 0 : index
    %c1 = arith.constant 1 : index
    %c0_4 = arith.constant 0 : index
    %c0_5 = arith.constant 0 : index
    %2 = vector.load %arg1[%c0_3, %c1, %c0_4, %c0_5] : memref<8x2x8x64xf32, #tpu.memory_space<vmem>>, vector<8x1x8x64xf32>
    %3 = vector.shape_cast %2 : vector<8x1x8x64xf32> to vector<8x8x64xf32>
    %4 = arith.maximumf %1, %3 : vector<8x8x64xf32>
    %5 = vector.extract_strided_slice %4 {offsets = [0, 0, 0], sizes = [8, 8, 32], strides = [1, 1, 1]} : vector<8x8x64xf32> to vector<8x8x32xf32>
    %6 = vector.extract_strided_slice %4 {offsets = [0, 0, 32], sizes = [8, 8, 32], strides = [1, 1, 1]} : vector<8x8x64xf32> to vector<8x8x32xf32>
    %7 = arith.maximumf %5, %6 : vector<8x8x32xf32>
    %c0_6 = arith.constant 0 : index
    %c0_7 = arith.constant 0 : index
    %c0_8 = arith.constant 0 : index
    %8 = vector.load %arg2[%c0_6, %c0_7, %c0_8] : memref<8x8x32xf32, #tpu.memory_space<vmem>>, vector<8x8x32xf32>
    tpu.vector_store %arg2[%c0_6, %c0_7, %c0_8], %7 {strides = array<i32>} : memref<8x8x32xf32, #tpu.memory_space<vmem>>, vector<8x8x32xf32>,
    return
  }
  func.func @transform_0(%arg0: i32) -> (i32, i32, i32, i32) {
    %c0_i32 = arith.constant 0 : i32
    %c0_i32_0 = arith.constant 0 : i32
    %c0_i32_1 = arith.constant 0 : i32
    %c0_i32_2 = arith.constant 0 : i32
    return %arg0, %c0_i32, %c0_i32_0, %c0_i32_1 : i32, i32, i32, i32
  }
  func.func @transform_1(%arg0: i32) -> (i32, i32, i32) {
    %c0_i32 = arith.constant 0 : i32
    %c0_i32_0 = arith.constant 0 : i32
    %c0_i32_1 = arith.constant 0 : i32
    return %arg0, %c0_i32, %c0_i32_0 : i32, i32, i32
  }
}

module attributes {stable_mosaic.version = 11 : i64} {
  func.func @kernel(%arg0: i32, %arg1: memref<64x288xf32, #tpu.memory_space<vmem>>, %arg2: memref<288x64xf32, #tpu.memory_space<vmem>>, %arg3: memref<1x64xf32, #tpu.memory_space<vmem>>, %arg4: memref<64x64xf32, #tpu.memory_space<vmem>>) attributes {dimension_semantics = [#tpu.dimension_semantics<parallel>], iteration_bounds = array<i64: 2>, scalar_prefetch = 0 : i64, scratch_operands = 0 : i64, tpu.core_type = #tpu.core_type<tc>, window_params = [{transform_indices = @transform_0, window_bounds = array<i64: 64, 288>}, {pipeline_mode = #tpu.pipeline_mode<synchronous>, transform_indices = @transform_1, window_bounds = array<i64: 288, 64>}, {pipeline_mode = #tpu.pipeline_mode<synchronous>, transform_indices = @transform_2, window_bounds = array<i64: 1, 64>}, {transform_indices = @transform_3, window_bounds = array<i64: 64, 64>}]} {
    %c0 = arith.constant 0 : index
    %c0_0 = arith.constant 0 : index
    %0 = vector.load %arg1[%c0, %c0_0] : memref<64x288xf32, #tpu.memory_space<vmem>>, vector<64x288xf32>
    %c0_1 = arith.constant 0 : index
    %c0_2 = arith.constant 0 : index
    %1 = vector.load %arg2[%c0_1, %c0_2] : memref<288x64xf32, #tpu.memory_space<vmem>>, vector<288x64xf32>
    %cst = arith.constant dense<0.000000e+00> : vector<64x64xf32>
    %2 = tpu.matmul %0, %1, %cst {dimension_numbers = #tpu.dot_dimension_numbers<[1], [0], [0], [1], [0, 0, 1, 1], [], []>} : vector<64x288xf32>, vector<288x64xf32>, vector<64x64xf32> -> vector<64x64xf32>
    %c0_3 = arith.constant 0 : index
    %c0_4 = arith.constant 0 : index
    %3 = vector.load %arg3[%c0_3, %c0_4] : memref<1x64xf32, #tpu.memory_space<vmem>>, vector<1x64xf32>
    %4 = vector.broadcast %3 : vector<1x64xf32> to vector<64x64xf32>
    %5 = arith.addf %2, %4 : vector<64x64xf32>
    %cst_5 = arith.constant 0.000000e+00 : f32
    %6 = vector.broadcast %cst_5 : f32 to vector<64x64xf32>
    %7 = arith.maximumf %5, %6 : vector<64x64xf32>
    %c0_6 = arith.constant 0 : index
    %c0_7 = arith.constant 0 : index
    %8 = vector.load %arg4[%c0_6, %c0_7] : memref<64x64xf32, #tpu.memory_space<vmem>>, vector<64x64xf32>
    tpu.vector_store %arg4[%c0_6, %c0_7], %7 {strides = array<i32>} : memref<64x64xf32, #tpu.memory_space<vmem>>, vector<64x64xf32>,
    return
  }
  func.func @transform_0(%arg0: i32) -> (i32, i32) {
    %c0_i32 = arith.constant 0 : i32
    %c0_i32_0 = arith.constant 0 : i32
    return %arg0, %c0_i32 : i32, i32
  }
  func.func @transform_1(%arg0: i32) -> (i32, i32) {
    %c0_i32 = arith.constant 0 : i32
    %c0_i32_0 = arith.constant 0 : i32
    %c0_i32_1 = arith.constant 0 : i32
    return %c0_i32, %c0_i32_0 : i32, i32
  }
  func.func @transform_2(%arg0: i32) -> (i32, i32) {
    %c0_i32 = arith.constant 0 : i32
    %c0_i32_0 = arith.constant 0 : i32
    %c0_i32_1 = arith.constant 0 : i32
    return %c0_i32, %c0_i32_0 : i32, i32
  }
  func.func @transform_3(%arg0: i32) -> (i32, i32) {
    %c0_i32 = arith.constant 0 : i32
    %c0_i32_0 = arith.constant 0 : i32
    return %arg0, %c0_i32 : i32, i32
  }
}

module attributes {stable_mosaic.version = 11 : i64} {
  func.func @kernel(%arg0: i32, %arg1: memref<8x2x4x128xf32, #tpu.memory_space<vmem>>, %arg2: memref<8x4x64xf32, #tpu.memory_space<vmem>>) attributes {dimension_semantics = [#tpu.dimension_semantics<parallel>], iteration_bounds = array<i64: 1>, scalar_prefetch = 0 : i64, scratch_operands = 0 : i64, tpu.core_type = #tpu.core_type<tc>, window_params = [{transform_indices = @transform_0, window_bounds = array<i64: 8, 2, 4, 128>}, {transform_indices = @transform_1, window_bounds = array<i64: 8, 4, 64>}]} {
    %c0 = arith.constant 0 : index
    %c0_0 = arith.constant 0 : index
    %c0_1 = arith.constant 0 : index
    %c0_2 = arith.constant 0 : index
    %0 = vector.load %arg1[%c0, %c0_0, %c0_1, %c0_2] : memref<8x2x4x128xf32, #tpu.memory_space<vmem>>, vector<8x1x4x128xf32>
    %1 = vector.shape_cast %0 : vector<8x1x4x128xf32> to vector<8x4x128xf32>
    %c0_3 = arith.constant 0 : index
    %c1 = arith.constant 1 : index
    %c0_4 = arith.constant 0 : index
    %c0_5 = arith.constant 0 : index
    %2 = vector.load %arg1[%c0_3, %c1, %c0_4, %c0_5] : memref<8x2x4x128xf32, #tpu.memory_space<vmem>>, vector<8x1x4x128xf32>
    %3 = vector.shape_cast %2 : vector<8x1x4x128xf32> to vector<8x4x128xf32>
    %4 = arith.maximumf %1, %3 : vector<8x4x128xf32>
    %5 = vector.extract_strided_slice %4 {offsets = [0, 0, 0], sizes = [8, 4, 64], strides = [1, 1, 1]} : vector<8x4x128xf32> to vector<8x4x64xf32>
    %6 = vector.extract_strided_slice %4 {offsets = [0, 0, 64], sizes = [8, 4, 64], strides = [1, 1, 1]} : vector<8x4x128xf32> to vector<8x4x64xf32>
    %7 = arith.maximumf %5, %6 : vector<8x4x64xf32>
    %c0_6 = arith.constant 0 : index
    %c0_7 = arith.constant 0 : index
    %c0_8 = arith.constant 0 : index
    %8 = vector.load %arg2[%c0_6, %c0_7, %c0_8] : memref<8x4x64xf32, #tpu.memory_space<vmem>>, vector<8x4x64xf32>
    tpu.vector_store %arg2[%c0_6, %c0_7, %c0_8], %7 {strides = array<i32>} : memref<8x4x64xf32, #tpu.memory_space<vmem>>, vector<8x4x64xf32>,
    return
  }
  func.func @transform_0(%arg0: i32) -> (i32, i32, i32, i32) {
    %c0_i32 = arith.constant 0 : i32
    %c0_i32_0 = arith.constant 0 : i32
    %c0_i32_1 = arith.constant 0 : i32
    %c0_i32_2 = arith.constant 0 : i32
    return %arg0, %c0_i32, %c0_i32_0, %c0_i32_1 : i32, i32, i32, i32
  }
  func.func @transform_1(%arg0: i32) -> (i32, i32, i32) {
    %c0_i32 = arith.constant 0 : i32
    %c0_i32_0 = arith.constant 0 : i32
    %c0_i32_1 = arith.constant 0 : i32
    return %arg0, %c0_i32, %c0_i32_0 : i32, i32, i32
  }
}

module attributes {stable_mosaic.version = 11 : i64} {
  func.func @kernel(%arg0: i32, %arg1: memref<16x576xf32, #tpu.memory_space<vmem>>, %arg2: memref<576x128xf32, #tpu.memory_space<vmem>>, %arg3: memref<1x128xf32, #tpu.memory_space<vmem>>, %arg4: memref<128x1xf32, #tpu.memory_space<vmem>>, %arg5: memref<1x1xf32, #tpu.memory_space<vmem>>, %arg6: memref<16x1xf32, #tpu.memory_space<vmem>>) attributes {dimension_semantics = [#tpu.dimension_semantics<parallel>], iteration_bounds = array<i64: 2>, scalar_prefetch = 0 : i64, scratch_operands = 0 : i64, tpu.core_type = #tpu.core_type<tc>, window_params = [{transform_indices = @transform_0, window_bounds = array<i64: 16, 576>}, {pipeline_mode = #tpu.pipeline_mode<synchronous>, transform_indices = @transform_1, window_bounds = array<i64: 576, 128>}, {pipeline_mode = #tpu.pipeline_mode<synchronous>, transform_indices = @transform_2, window_bounds = array<i64: 1, 128>}, {pipeline_mode = #tpu.pipeline_mode<synchronous>, transform_indices = @transform_3, window_bounds = array<i64: 128, 1>}, {pipeline_mode = #tpu.pipeline_mode<synchronous>, transform_indices = @transform_4, window_bounds = array<i64: 1, 1>}, {transform_indices = @transform_5, window_bounds = array<i64: 16, 1>}]} {
    %c0 = arith.constant 0 : index
    %c0_0 = arith.constant 0 : index
    %0 = vector.load %arg1[%c0, %c0_0] : memref<16x576xf32, #tpu.memory_space<vmem>>, vector<16x576xf32>
    %c0_1 = arith.constant 0 : index
    %c0_2 = arith.constant 0 : index
    %1 = vector.load %arg2[%c0_1, %c0_2] : memref<576x128xf32, #tpu.memory_space<vmem>>, vector<576x128xf32>
    %cst = arith.constant dense<0.000000e+00> : vector<16x128xf32>
    %2 = tpu.matmul %0, %1, %cst {dimension_numbers = #tpu.dot_dimension_numbers<[1], [0], [0], [1], [0, 0, 1, 1], [], []>} : vector<16x576xf32>, vector<576x128xf32>, vector<16x128xf32> -> vector<16x128xf32>
    %c0_3 = arith.constant 0 : index
    %c0_4 = arith.constant 0 : index
    %3 = vector.load %arg3[%c0_3, %c0_4] : memref<1x128xf32, #tpu.memory_space<vmem>>, vector<1x128xf32>
    %4 = vector.broadcast %3 : vector<1x128xf32> to vector<16x128xf32>
    %5 = arith.addf %2, %4 : vector<16x128xf32>
    %cst_5 = arith.constant 0.000000e+00 : f32
    %6 = vector.broadcast %cst_5 : f32 to vector<16x128xf32>
    %7 = arith.maximumf %5, %6 : vector<16x128xf32>
    %c0_6 = arith.constant 0 : index
    %c0_7 = arith.constant 0 : index
    %8 = vector.load %arg4[%c0_6, %c0_7] : memref<128x1xf32, #tpu.memory_space<vmem>>, vector<128x1xf32>
    %cst_8 = arith.constant dense<0.000000e+00> : vector<16x1xf32>
    %9 = tpu.matmul %7, %8, %cst_8 {dimension_numbers = #tpu.dot_dimension_numbers<[1], [0], [0], [1], [0, 0, 1, 1], [], []>} : vector<16x128xf32>, vector<128x1xf32>, vector<16x1xf32> -> vector<16x1xf32>
    %c0_9 = arith.constant 0 : index
    %c0_10 = arith.constant 0 : index
    %10 = vector.load %arg5[%c0_9, %c0_10] : memref<1x1xf32, #tpu.memory_space<vmem>>, vector<1x1xf32>
    %11 = vector.broadcast %10 : vector<1x1xf32> to vector<16x1xf32>
    %12 = arith.addf %9, %11 : vector<16x1xf32>
    %c0_11 = arith.constant 0 : index
    %c0_12 = arith.constant 0 : index
    %13 = vector.load %arg6[%c0_11, %c0_12] : memref<16x1xf32, #tpu.memory_space<vmem>>, vector<16x1xf32>
    tpu.vector_store %arg6[%c0_11, %c0_12], %12 {strides = array<i32>} : memref<16x1xf32, #tpu.memory_space<vmem>>, vector<16x1xf32>,
    return
  }
  func.func @transform_0(%arg0: i32) -> (i32, i32) {
    %c0_i32 = arith.constant 0 : i32
    %c0_i32_0 = arith.constant 0 : i32
    return %arg0, %c0_i32 : i32, i32
  }
  func.func @transform_1(%arg0: i32) -> (i32, i32) {
    %c0_i32 = arith.constant 0 : i32
    %c0_i32_0 = arith.constant 0 : i32
    %c0_i32_1 = arith.constant 0 : i32
    return %c0_i32, %c0_i32_0 : i32, i32
  }
  func.func @transform_2(%arg0: i32) -> (i32, i32) {
    %c0_i32 = arith.constant 0 : i32
    %c0_i32_0 = arith.constant 0 : i32
    %c0_i32_1 = arith.constant 0 : i32
    return %c0_i32, %c0_i32_0 : i32, i32
  }
  func.func @transform_3(%arg0: i32) -> (i32, i32) {
    %c0_i32 = arith.constant 0 : i32
    %c0_i32_0 = arith.constant 0 : i32
    %c0_i32_1 = arith.constant 0 : i32
    return %c0_i32, %c0_i32_0 : i32, i32
  }
  func.func @transform_4(%arg0: i32) -> (i32, i32) {
    %c0_i32 = arith.constant 0 : i32
    %c0_i32_0 = arith.constant 0 : i32
    %c0_i32_1 = arith.constant 0 : i32
    return %c0_i32, %c0_i32_0 : i32, i32
  }
  func.func @transform_5(%arg0: i32) -> (i32, i32) {
    %c0_i32 = arith.constant 0 : i32
    %c0_i32_0 = arith.constant 0 : i32
    return %arg0, %c0_i32 : i32, i32
  }
}

</mosaic_0001>

<bundles_post_ra>
// kernel: video_comperator_forward.6
= control target key start
LH: loop header
LB: loop body
LE: loop exit
PB: predicated region body
PF: predicated region fallthrough
CT: control target
= control target key end

     0   :  { %s302_s6 = smov 0   ;;  %s331_s0 = inlined_call_operand.vmem [shape: f32[16,2,8,64], index: 0, kind: input, shape index: {}]   ;;  %s332_s1 = inlined_call_operand.vmem [shape: f32[16,8,32], index: 1, kind: output, shape index: {}]  }
   0x1 LB: > { %s253_s7 = sadd.s32 4294967295, %s289_s6   ;;  %p257_p0 = scmp.ge.s32.totalorder %s289_s6, 1  ;;  %s289_s6 = sphi %s302_s6, %s11_s6  }
   0x2   : > { %p89_p1 = scmp.lt.s32.totalorder %s289_s6, 3 }
   0x4   : > { %p90_p2 = pnand %p257_p0, %p89_p1 }
   0x5   : > { %s258_s8 = sshll.u32 (!%p90_p2), %s253_s7, 3  ;;  %s291_s13 = smov (!%p90_p2), 96  }
   0x6   : > { %93 = sbr.rel (%p90_p2) target bundleno = 148 (0x94), region = 24  ;;  %p111_p3 = scmp.lt.s32.totalorder (!%p90_p2), %s258_s8, 15 }
   0xb   : > { %s334_s8 = smov (!%p111_p3, %s258_s8), 15  ;;  %vm188_vm0 = vcmask 261120  }
   0xc   : > { %s273_s9 = sshll.u32 %s334_s8, 4  ;;  %s262_s14 = sshll.u32 %s334_s8, 3 }
   0xd   : > { %s115_s12 = scalar_lea.vmem %s331_s0, %s273_s9  ;;  %s121_s17 = scalar_lea.vmem %s332_s1, %s262_s14 }
   0xe   : > { %v125_v0 = vld [vmem:[%s115_s12 + $0x20] sm:$0xff]  ;;  %v265_v1 = vld [vmem:[%s115_s12 + $0x28] sm:$0xff]  ;;  %v126_v5 = vld [vmem:[%s115_s12 + $0x30] sm:$0xff] }
   0xf   : > { %v123_v2 = vld [vmem:[%s115_s12] sm:$0xff]  ;;  %v142_v3 = vmax.f32 %v125_v0, %v265_v1  ;;  %v263_v4 = vld [vmem:[%s115_s12 + $0x8] sm:$0xff]  ;;  %v266_v6 = vld [vmem:[%s115_s12 + $0x38] sm:$0xff] }
  0x10   : > { %v140_v7 = vmax.f32 %v123_v2, %v263_v4  ;;  %v124_v8 = vld [vmem:[%s115_s12 + $0x10] sm:$0xff]  ;;  %v264_v9 = vld [vmem:[%s115_s12 + $0x18] sm:$0xff]  ;;  %v143_v10 = vmax.f32 %v126_v5, %v266_v6  ;;  %v127_v14 = vld [vmem:[%s115_s12 + $0x40] sm:$0xff] }
  0x11   : > { %160 = vrot.lane.b32.xlu1 %v142_v3, %s291_s13  ;;  %v141_v11 = vmax.f32 %v124_v8, %v264_v9  ;;  %v128_v12 = vld [vmem:[%s115_s12 + $0x50] sm:$0xff]  ;;  %v268_v13 = vld [vmem:[%s115_s12 + $0x58] sm:$0xff]  ;;  %v267_v15 = vld [vmem:[%s115_s12 + $0x48] sm:$0xff] }
  0x12   : > { %156 = vrot.lane.b32.xlu0 %v140_v7, %s291_s13  ;;  %v145_v16 = vmax.f32 %v128_v12, %v268_v13  ;;  %v144_v17 = vmax.f32 %v127_v14, %v267_v15  ;;  %v130_v18 = vld [vmem:[%s115_s12 + $0x70] sm:$0xff]  ;;  %v270_v19 = vld [vmem:[%s115_s12 + $0x78] sm:$0xff]  ;;  %v129_v20 = vld [vmem:[%s115_s12 + $0x60] sm:$0xff] }
  0x13   : > { %v269_v21 = vld [vmem:[%s115_s12 + $0x68] sm:$0xff]  ;;  %v147_v22 = vmax.f32 %v130_v18, %v270_v19 }
  0x14   : > { %v146_v23 = vmax.f32 %v129_v20, %v269_v21 }
  0x15   : > { %162 = vrot.lane.b32.xlu1 %v143_v10, %s291_s13 }
  0x16   : > { %158 = vrot.lane.b32.xlu0 %v141_v11, %s291_s13 }
  0x19   : > { %166 = vrot.lane.b32.xlu1 %v145_v16, %s291_s13 }
  0x1a   : > { %164 = vrot.lane.b32.xlu0 %v144_v17, %s291_s13 }
  0x1d   : > { %170 = vrot.lane.b32.xlu1 %v147_v22, %s291_s13 }
  0x1e   : > { %168 = vrot.lane.b32.xlu0 %v146_v23, %s291_s13 }
  0x83   : > { %v161_v24 = vpop.permute.xlu1 %160 }
  0x84   : > { %v182_v25 = vmax.f32 %v142_v3, %v161_v24  ;;  %v157_v26 = vpop.permute.xlu0 %156 }
  0x85   : > { %v180_v27 = vmax.f32 %v140_v7, %v157_v26 }
  0x86   : > { %191 = vst.msk [vmem:[%s121_s17 + $0x10] sm:$0xff] %vm188_vm0, %v182_v25 }
  0x87   : > { %189 = vst.msk [vmem:[%s121_s17] sm:$0xff] %vm188_vm0, %v180_v27  ;;  %v163_v28 = vpop.permute.xlu1 %162 }
  0x88   : > { %v183_v29 = vmax.f32 %v143_v10, %v163_v28  ;;  %v159_v30 = vpop.permute.xlu0 %158 }
  0x89   : > { %v181_v31 = vmax.f32 %v141_v11, %v159_v30 }
  0x8a   : > { %192 = vst.msk [vmem:[%s121_s17 + $0x18] sm:$0xff] %vm188_vm0, %v183_v29 }
  0x8b   : > { %190 = vst.msk [vmem:[%s121_s17 + $0x8] sm:$0xff] %vm188_vm0, %v181_v31  ;;  %v167_v32 = vpop.permute.xlu1 %166 }
  0x8c   : > { %v185_v33 = vmax.f32 %v145_v16, %v167_v32  ;;  %v165_v34 = vpop.permute.xlu0 %164 }
  0x8d   : > { %v184_v35 = vmax.f32 %v144_v17, %v165_v34 }
  0x8e   : > { %194 = vst.msk [vmem:[%s121_s17 + $0x28] sm:$0xff] %vm188_vm0, %v185_v33 }
  0x8f   : > { %193 = vst.msk [vmem:[%s121_s17 + $0x20] sm:$0xff] %vm188_vm0, %v184_v35  ;;  %v171_v36 = vpop.permute.xlu1 %170 }
  0x90   : > { %v187_v37 = vmax.f32 %v147_v22, %v171_v36  ;;  %v169_v38 = vpop.permute.xlu0 %168 }
  0x91   : > { %v186_v39 = vmax.f32 %v146_v23, %v169_v38 }
  0x92   : > { %196 = vst.msk [vmem:[%s121_s17 + $0x38] sm:$0xff] %vm188_vm0, %v187_v37 }
  0x93   : > { %195 = vst.msk [vmem:[%s121_s17 + $0x30] sm:$0xff] %vm188_vm0, %v186_v39 }
  0x94 PF: > { %s11_s6 = sadd.s32 1, %s289_s6  }
  0x95   : > { %p8_p4 = scmp.ge.s32.totalorder %s11_s6, 4  }
  0x97   :  { %10 = sbr.rel (!%p8_p4) target bundleno = 1 (0x1), region = 55 }

// kernel: video_comperator_forward.5
= control target key start
LH: loop header
LB: loop body
LE: loop exit
PB: predicated region body
PF: predicated region fallthrough
CT: control target
= control target key end

     0   :  { %s828_s12 = smov 0   ;;  %s1027_s0 = inlined_call_operand.vmem [shape: f32[512,16], index: 0, kind: input, shape index: {}]   ;;  %s1028_s1 = inlined_call_operand.vmem [shape: f32[16,32], index: 1, kind: input, shape index: {}]   ;;  %s1029_s2 = inlined_call_operand.vmem [shape: f32[1,32], index: 2, kind: input, shape index: {}]   ;;  %s1030_s3 = inlined_call_operand.vmem [shape: f32[512,32], index: 3, kind: output, shape index: {}]  }
   0x1 LB: > { %s658_s13 = sadd.s32 4294967295, %s806_s12   ;;  %p662_p0 = scmp.ge.s32.totalorder %s806_s12, 1  ;;  %s806_s12 = sphi %s828_s12, %s13_s12  }
   0x2   : > { %p138_p1 = scmp.lt.s32.totalorder %s806_s12, 3 }
   0x4   : > { %p139_p2 = pnand %p662_p0, %p138_p1 }
   0x5   : > { %s663_s18 = sshll.u32 (!%p139_p2), %s658_s13, 5 }
   0x6   : > { %142 = sbr.rel (%p139_p2) target bundleno = 245 (0xf5), region = 32  ;;  %p163_p3 = scmp.lt.s32.totalorder (!%p139_p2), %s663_s18, 63 }
   0xb   : > { %v207_v0 = vld [vmem:[%s1028_s1 + $0x8] sm:$0xff]  ;;  %v206_v1 = vld [vmem:[%s1028_s1] sm:$0xff]  ;;  %s1032_s18 = smov (!%p163_p3, %s663_s18), 63  ;;  %vm215_vm0 = vcmask 130048   ;;  %vm569_vm1 = vcmask 261120  }
   0xc   : > { %736 = vmatprep.subr.mxu0 %v207_v0  ;;  %788 = vmatprep.subr.mxu1 %v207_v0  ;;  %s664_s19 = sshll.u32 %s1032_s18, 3  ;;  %v919_v34 = vld [vmem:[%s1029_s2] ss:$0 sm:$0xff] }
   0xd   : > { %737 = vmatpush3.msra.mxu0 %v207_v0  ;;  %790 = vmatpush3.msra.mxu1 %v207_v0  ;;  %s850_s22 = scalar_lea.vmem %s1027_s0, %s664_s19  ;;  %s928_s27 = scalar_lea.vmem %s1030_s3, %s664_s19 }
   0xe   : > { %738 = vmatprep.subr.mxu0 %v206_v1  ;;  %789 = vmatprep.subr.mxu1 %v206_v1  ;;  %v174_v2 = vld [vmem:[%s850_s22] sm:$0xff]  ;;  %v175_v4 = vld [vmem:[%s850_s22 + $0x8] sm:$0xff]  ;;  %v176_v6 = vld [vmem:[%s850_s22 + $0x10] sm:$0xff] }
   0xf   : > { %739 = vmatpush3.msra.mxu0 %v206_v1  ;;  %791 = vmatpush3.msra.mxu1 %v206_v1  ;;  %v190_v3 = vld [vmem:[%s850_s22 + $0x80] sm:$0xff]  ;;  %v191_v5 = vld [vmem:[%s850_s22 + $0x88] sm:$0xff]  ;;  %v192_v7 = vld [vmem:[%s850_s22 + $0x90] sm:$0xff] }
  0x10   : > { %740 = vmatprep.mubr.msk.f32.mxu0 %vm215_vm0, %v174_v2  ;;  %764 = vmatprep.mubr.msk.f32.mxu1 %vm215_vm0, %v190_v3  ;;  %v177_v8 = vld [vmem:[%s850_s22 + $0x18] sm:$0xff]  ;;  %v178_v10 = vld [vmem:[%s850_s22 + $0x20] sm:$0xff]  ;;  %v179_v12 = vld [vmem:[%s850_s22 + $0x28] sm:$0xff] }
  0x11   : > { %741 = vmatmul.mubr.msk.f32.vlgmr.msra.gmra.mxu0 %vm215_vm0, %v175_v4  ;;  %765 = vmatmul.mubr.msk.f32.vlgmr.msra.gmra.mxu1 %vm215_vm0, %v191_v5  ;;  %v193_v9 = vld [vmem:[%s850_s22 + $0x98] sm:$0xff]  ;;  %v194_v11 = vld [vmem:[%s850_s22 + $0xa0] sm:$0xff]  ;;  %v195_v13 = vld [vmem:[%s850_s22 + $0xa8] sm:$0xff] }
  0x12   : > { %743 = vmatprep.mubr.msk.f32.mxu0 %vm215_vm0, %v176_v6  ;;  %767 = vmatprep.mubr.msk.f32.mxu1 %vm215_vm0, %v192_v7  ;;  %v180_v14 = vld [vmem:[%s850_s22 + $0x30] sm:$0xff]  ;;  %v181_v16 = vld [vmem:[%s850_s22 + $0x38] sm:$0xff]  ;;  %v182_v18 = vld [vmem:[%s850_s22 + $0x40] sm:$0xff] }
  0x13   : > { %v196_v15 = vld [vmem:[%s850_s22 + $0xb0] sm:$0xff]  ;;  %v197_v17 = vld [vmem:[%s850_s22 + $0xb8] sm:$0xff]  ;;  %v198_v19 = vld [vmem:[%s850_s22 + $0xc0] sm:$0xff] }
  0x14   : > { %v183_v20 = vld [vmem:[%s850_s22 + $0x48] sm:$0xff]  ;;  %v184_v22 = vld [vmem:[%s850_s22 + $0x50] sm:$0xff]  ;;  %v185_v24 = vld [vmem:[%s850_s22 + $0x58] sm:$0xff] }
  0x15   : > { %744 = vmatmul.mubr.msk.f32.gmra.mxu0 %vm215_vm0, %v177_v8  ;;  %768 = vmatmul.mubr.msk.f32.gmra.mxu1 %vm215_vm0, %v193_v9  ;;  %v199_v21 = vld [vmem:[%s850_s22 + $0xc8] sm:$0xff]  ;;  %v200_v23 = vld [vmem:[%s850_s22 + $0xd0] sm:$0xff]  ;;  %v201_v25 = vld [vmem:[%s850_s22 + $0xd8] sm:$0xff] }
  0x16   : > { %746 = vmatprep.mubr.msk.f32.mxu0 %vm215_vm0, %v178_v10  ;;  %770 = vmatprep.mubr.msk.f32.mxu1 %vm215_vm0, %v194_v11  ;;  %v186_v26 = vld [vmem:[%s850_s22 + $0x60] sm:$0xff]  ;;  %v187_v28 = vld [vmem:[%s850_s22 + $0x68] sm:$0xff]  ;;  %v188_v30 = vld [vmem:[%s850_s22 + $0x70] sm:$0xff] }
  0x17   : > { %v202_v27 = vld [vmem:[%s850_s22 + $0xe0] sm:$0xff]  ;;  %v203_v29 = vld [vmem:[%s850_s22 + $0xe8] sm:$0xff]  ;;  %v204_v31 = vld [vmem:[%s850_s22 + $0xf0] sm:$0xff] }
  0x18   : > { %v189_v32 = vld [vmem:[%s850_s22 + $0x78] sm:$0xff] }
  0x19   : > { %747 = vmatmul.mubr.msk.f32.gmra.mxu0 %vm215_vm0, %v179_v12  ;;  %771 = vmatmul.mubr.msk.f32.gmra.mxu1 %vm215_vm0, %v195_v13  ;;  %v205_v33 = vld [vmem:[%s850_s22 + $0xf8] sm:$0xff] }
  0x1a   : > { %749 = vmatprep.mubr.msk.f32.mxu0 %vm215_vm0, %v180_v14  ;;  %773 = vmatprep.mubr.msk.f32.mxu1 %vm215_vm0, %v196_v15 }
  0x1d   : > { %750 = vmatmul.mubr.msk.f32.gmra.mxu0 %vm215_vm0, %v181_v16  ;;  %774 = vmatmul.mubr.msk.f32.gmra.mxu1 %vm215_vm0, %v197_v17 }
  0x1e   : > { %752 = vmatprep.mubr.msk.f32.mxu0 %vm215_vm0, %v182_v18  ;;  %776 = vmatprep.mubr.msk.f32.mxu1 %vm215_vm0, %v198_v19 }
  0x21   : > { %753 = vmatmul.mubr.msk.f32.gmra.mxu0 %vm215_vm0, %v183_v20  ;;  %777 = vmatmul.mubr.msk.f32.gmra.mxu1 %vm215_vm0, %v199_v21 }
  0x22   : > { %755 = vmatprep.mubr.msk.f32.mxu0 %vm215_vm0, %v184_v22  ;;  %779 = vmatprep.mubr.msk.f32.mxu1 %vm215_vm0, %v200_v23 }
  0x25   : > { %756 = vmatmul.mubr.msk.f32.gmra.mxu0 %vm215_vm0, %v185_v24  ;;  %780 = vmatmul.mubr.msk.f32.gmra.mxu1 %vm215_vm0, %v201_v25 }
  0x26   : > { %758 = vmatprep.mubr.msk.f32.mxu0 %vm215_vm0, %v186_v26  ;;  %782 = vmatprep.mubr.msk.f32.mxu1 %vm215_vm0, %v202_v27 }
  0x29   : > { %759 = vmatmul.mubr.msk.f32.gmra.mxu0 %vm215_vm0, %v187_v28  ;;  %783 = vmatmul.mubr.msk.f32.gmra.mxu1 %vm215_vm0, %v203_v29 }
  0x2a   : > { %761 = vmatprep.mubr.msk.f32.mxu0 %vm215_vm0, %v188_v30  ;;  %785 = vmatprep.mubr.msk.f32.mxu1 %vm215_vm0, %v204_v31 }
  0x2d   : > { %762 = vmatmul.mubr.msk.f32.gmra.mxu0 %vm215_vm0, %v189_v32  ;;  %786 = vmatmul.mubr.msk.f32.gmra.mxu1 %vm215_vm0, %v205_v33 }
  0xd1   : > { %v742_v35 = vpop.f32.mrf.mxu0  ;;  %v766_v36 = vpop.f32.mrf.mxu1 }
  0xd2   : > { %v384_v37 = vadd.f32 %v742_v35, %v919_v34  ;;  %v464_v38 = vadd.f32 %v766_v36, %v919_v34 }
  0xd3   : > { %v378_v39 = vpop.f32.mrf.mxu0  ;;  %v458_v40 = vpop.f32.mrf.mxu1 }
  0xd4   : > { %v538_v41 = vmax.f32 %v384_v37, 0.0  ;;  %v554_v42 = vmax.f32 %v464_v38, 0.0  ;;  %v379_v43 = vadd.f32 %v919_v34, %v378_v39  ;;  %v459_v44 = vadd.f32 %v919_v34, %v458_v40 }
  0xd5   : > { %v745_v45 = vpop.f32.mrf.mxu0  ;;  %v769_v46 = vpop.f32.mrf.mxu1 }
  0xd6   : > { %571 = vst.msk [vmem:[%s928_s27 + $0x8] sm:$0xff] %vm569_vm1, %v538_v41  ;;  %587 = vst.msk [vmem:[%s928_s27 + $0x88] sm:$0xff] %vm569_vm1, %v554_v42  ;;  %v537_v47 = vmax.f32 %v379_v43, 0.0  ;;  %v553_v48 = vmax.f32 %v459_v44, 0.0  ;;  %v394_v49 = vadd.f32 %v745_v45, %v919_v34  ;;  %v474_v50 = vadd.f32 %v769_v46, %v919_v34 }
  0xd7   : > { %v388_v51 = vpop.f32.mrf.mxu0  ;;  %v468_v52 = vpop.f32.mrf.mxu1 }
  0xd8   : > { %570 = vst.msk [vmem:[%s928_s27] sm:$0xff] %vm569_vm1, %v537_v47  ;;  %586 = vst.msk [vmem:[%s928_s27 + $0x80] sm:$0xff] %vm569_vm1, %v553_v48  ;;  %v540_v53 = vmax.f32 %v394_v49, 0.0  ;;  %v556_v54 = vmax.f32 %v474_v50, 0.0  ;;  %v389_v55 = vadd.f32 %v919_v34, %v388_v51  ;;  %v469_v56 = vadd.f32 %v919_v34, %v468_v52 }
  0xd9   : > { %v748_v57 = vpop.f32.mrf.mxu0  ;;  %v772_v58 = vpop.f32.mrf.mxu1 }
  0xda   : > { %573 = vst.msk [vmem:[%s928_s27 + $0x18] sm:$0xff] %vm569_vm1, %v540_v53  ;;  %589 = vst.msk [vmem:[%s928_s27 + $0x98] sm:$0xff] %vm569_vm1, %v556_v54  ;;  %v539_v59 = vmax.f32 %v389_v55, 0.0  ;;  %v555_v60 = vmax.f32 %v469_v56, 0.0  ;;  %v404_v61 = vadd.f32 %v748_v57, %v919_v34  ;;  %v484_v62 = vadd.f32 %v772_v58, %v919_v34 }
  0xdb   : > { %v398_v63 = vpop.f32.mrf.mxu0  ;;  %v478_v0 = vpop.f32.mrf.mxu1 }
  0xdc   : > { %572 = vst.msk [vmem:[%s928_s27 + $0x10] sm:$0xff] %vm569_vm1, %v539_v59  ;;  %588 = vst.msk [vmem:[%s928_s27 + $0x90] sm:$0xff] %vm569_vm1, %v555_v60  ;;  %v542_v1 = vmax.f32 %v404_v61, 0.0  ;;  %v558_v2 = vmax.f32 %v484_v62, 0.0  ;;  %v399_v3 = vadd.f32 %v919_v34, %v398_v63  ;;  %v479_v4 = vadd.f32 %v919_v34, %v478_v0 }
  0xdd   : > { %v751_v5 = vpop.f32.mrf.mxu0  ;;  %v775_v6 = vpop.f32.mrf.mxu1 }
  0xde   : > { %575 = vst.msk [vmem:[%s928_s27 + $0x28] sm:$0xff] %vm569_vm1, %v542_v1  ;;  %591 = vst.msk [vmem:[%s928_s27 + $0xa8] sm:$0xff] %vm569_vm1, %v558_v2  ;;  %v541_v7 = vmax.f32 %v399_v3, 0.0  ;;  %v557_v8 = vmax.f32 %v479_v4, 0.0  ;;  %v414_v9 = vadd.f32 %v751_v5, %v919_v34  ;;  %v494_v10 = vadd.f32 %v775_v6, %v919_v34 }
  0xdf   : > { %v408_v11 = vpop.f32.mrf.mxu0  ;;  %v488_v12 = vpop.f32.mrf.mxu1 }
  0xe0   : > { %574 = vst.msk [vmem:[%s928_s27 + $0x20] sm:$0xff] %vm569_vm1, %v541_v7  ;;  %590 = vst.msk [vmem:[%s928_s27 + $0xa0] sm:$0xff] %vm569_vm1, %v557_v8  ;;  %v544_v13 = vmax.f32 %v414_v9, 0.0  ;;  %v560_v14 = vmax.f32 %v494_v10, 0.0  ;;  %v409_v15 = vadd.f32 %v919_v34, %v408_v11  ;;  %v489_v16 = vadd.f32 %v919_v34, %v488_v12 }
  0xe1   : > { %v754_v17 = vpop.f32.mrf.mxu0  ;;  %v778_v18 = vpop.f32.mrf.mxu1 }
  0xe2   : > { %577 = vst.msk [vmem:[%s928_s27 + $0x38] sm:$0xff] %vm569_vm1, %v544_v13  ;;  %593 = vst.msk [vmem:[%s928_s27 + $0xb8] sm:$0xff] %vm569_vm1, %v560_v14  ;;  %v543_v19 = vmax.f32 %v409_v15, 0.0  ;;  %v559_v20 = vmax.f32 %v489_v16, 0.0  ;;  %v424_v21 = vadd.f32 %v754_v17, %v919_v34  ;;  %v504_v22 = vadd.f32 %v778_v18, %v919_v34 }
  0xe3   : > { %v418_v23 = vpop.f32.mrf.mxu0  ;;  %v498_v24 = vpop.f32.mrf.mxu1 }
  0xe4   : > { %576 = vst.msk [vmem:[%s928_s27 + $0x30] sm:$0xff] %vm569_vm1, %v543_v19  ;;  %592 = vst.msk [vmem:[%s928_s27 + $0xb0] sm:$0xff] %vm569_vm1, %v559_v20  ;;  %v546_v25 = vmax.f32 %v424_v21, 0.0  ;;  %v562_v26 = vmax.f32 %v504_v22, 0.0  ;;  %v419_v27 = vadd.f32 %v919_v34, %v418_v23  ;;  %v499_v28 = vadd.f32 %v919_v34, %v498_v24 }
  0xe5   : > { %v757_v29 = vpop.f32.mrf.mxu0  ;;  %v781_v30 = vpop.f32.mrf.mxu1 }
  0xe6   : > { %579 = vst.msk [vmem:[%s928_s27 + $0x48] sm:$0xff] %vm569_vm1, %v546_v25  ;;  %595 = vst.msk [vmem:[%s928_s27 + $0xc8] sm:$0xff] %vm569_vm1, %v562_v26  ;;  %v545_v31 = vmax.f32 %v419_v27, 0.0  ;;  %v561_v32 = vmax.f32 %v499_v28, 0.0  ;;  %v434_v33 = vadd.f32 %v757_v29, %v919_v34  ;;  %v514_v35 = vadd.f32 %v781_v30, %v919_v34 }
  0xe7   : > { %v428_v36 = vpop.f32.mrf.mxu0  ;;  %v508_v37 = vpop.f32.mrf.mxu1 }
  0xe8   : > { %578 = vst.msk [vmem:[%s928_s27 + $0x40] sm:$0xff] %vm569_vm1, %v545_v31  ;;  %594 = vst.msk [vmem:[%s928_s27 + $0xc0] sm:$0xff] %vm569_vm1, %v561_v32  ;;  %v548_v38 = vmax.f32 %v434_v33, 0.0  ;;  %v564_v39 = vmax.f32 %v514_v35, 0.0  ;;  %v429_v40 = vadd.f32 %v919_v34, %v428_v36  ;;  %v509_v41 = vadd.f32 %v919_v34, %v508_v37 }
  0xe9   : > { %v760_v42 = vpop.f32.mrf.mxu0  ;;  %v784_v43 = vpop.f32.mrf.mxu1 }
  0xea   : > { %581 = vst.msk [vmem:[%s928_s27 + $0x58] sm:$0xff] %vm569_vm1, %v548_v38  ;;  %597 = vst.msk [vmem:[%s928_s27 + $0xd8] sm:$0xff] %vm569_vm1, %v564_v39  ;;  %v547_v44 = vmax.f32 %v429_v40, 0.0  ;;  %v563_v45 = vmax.f32 %v509_v41, 0.0  ;;  %v444_v46 = vadd.f32 %v760_v42, %v919_v34  ;;  %v524_v47 = vadd.f32 %v784_v43, %v919_v34 }
  0xeb   : > { %v438_v48 = vpop.f32.mrf.mxu0  ;;  %v518_v49 = vpop.f32.mrf.mxu1 }
  0xec   : > { %580 = vst.msk [vmem:[%s928_s27 + $0x50] sm:$0xff] %vm569_vm1, %v547_v44  ;;  %596 = vst.msk [vmem:[%s928_s27 + $0xd0] sm:$0xff] %vm569_vm1, %v563_v45  ;;  %v550_v50 = vmax.f32 %v444_v46, 0.0  ;;  %v566_v51 = vmax.f32 %v524_v47, 0.0  ;;  %v439_v52 = vadd.f32 %v919_v34, %v438_v48  ;;  %v519_v53 = vadd.f32 %v919_v34, %v518_v49 }
  0xed   : > { %v763_v54 = vpop.f32.mrf.mxu0  ;;  %v787_v55 = vpop.f32.mrf.mxu1 }
  0xee   : > { %583 = vst.msk [vmem:[%s928_s27 + $0x68] sm:$0xff] %vm569_vm1, %v550_v50  ;;  %599 = vst.msk [vmem:[%s928_s27 + $0xe8] sm:$0xff] %vm569_vm1, %v566_v51  ;;  %v549_v56 = vmax.f32 %v439_v52, 0.0  ;;  %v565_v57 = vmax.f32 %v519_v53, 0.0  ;;  %v454_v58 = vadd.f32 %v763_v54, %v919_v34  ;;  %v534_v59 = vadd.f32 %v787_v55, %v919_v34 }
  0xef   : > { %v448_v60 = vpop.f32.mrf.mxu0  ;;  %v528_v61 = vpop.f32.mrf.mxu1 }
  0xf0   : > { %582 = vst.msk [vmem:[%s928_s27 + $0x60] sm:$0xff] %vm569_vm1, %v549_v56  ;;  %598 = vst.msk [vmem:[%s928_s27 + $0xe0] sm:$0xff] %vm569_vm1, %v565_v57  ;;  %v552_v62 = vmax.f32 %v454_v58, 0.0  ;;  %v568_v63 = vmax.f32 %v534_v59, 0.0  ;;  %v449_v0 = vadd.f32 %v919_v34, %v448_v60  ;;  %v529_v1 = vadd.f32 %v919_v34, %v528_v61 }
  0xf2   : > { %585 = vst.msk [vmem:[%s928_s27 + $0x78] sm:$0xff] %vm569_vm1, %v552_v62  ;;  %601 = vst.msk [vmem:[%s928_s27 + $0xf8] sm:$0xff] %vm569_vm1, %v568_v63  ;;  %v551_v2 = vmax.f32 %v449_v0, 0.0  ;;  %v567_v3 = vmax.f32 %v529_v1, 0.0 }
  0xf4   : > { %584 = vst.msk [vmem:[%s928_s27 + $0x70] sm:$0xff] %vm569_vm1, %v551_v2  ;;  %600 = vst.msk [vmem:[%s928_s27 + $0xf0] sm:$0xff] %vm569_vm1, %v567_v3 }
  0xf5 PF: > { %s13_s12 = sadd.s32 1, %s806_s12  }
  0xf6   : > { %p10_p4 = scmp.ge.s32.totalorder %s13_s12, 4  }
  0xf8   :  { %12 = sbr.rel (!%p10_p4) target bundleno = 1 (0x1), region = 62 }

// kernel: video_comperator_forward.7
= control target key start
LH: loop header
LB: loop body
LE: loop exit
PB: predicated region body
PF: predicated region fallthrough
CT: control target
= control target key end

     0   :  { %s729_s12 = smov 0   ;;  %s915_s0 = inlined_call_operand.vmem [shape: f32[128,288], index: 0, kind: input, shape index: {}]   ;;  %s916_s1 = inlined_call_operand.vmem [shape: f32[288,64], index: 1, kind: input, shape index: {}]   ;;  %s917_s2 = inlined_call_operand.vmem [shape: f32[1,64], index: 2, kind: input, shape index: {}]   ;;  %s918_s3 = inlined_call_operand.vmem [shape: f32[128,64], index: 3, kind: output, shape index: {}]  }
   0x1 LB: > { %s552_s13 = sadd.s32 4294967295, %s707_s12   ;;  %p556_p0 = scmp.ge.s32.totalorder %s707_s12, 1  ;;  %s707_s12 = sphi %s729_s12, %s13_s12  }
   0x2   : > { %p139_p1 = scmp.lt.s32.totalorder %s707_s12, 3 }
   0x4   : > { %p140_p2 = pnand %p556_p0, %p139_p1 }
   0x5   : > { %s557_s19 = sshll.u32 (!%p140_p2), %s552_s13, 3 }
   0x6   : > { %143 = sbr.rel (%p140_p2) target bundleno = 269 (0x10d), region = 32  ;;  %p165_p3 = scmp.lt.s32.totalorder (!%p140_p2), %s557_s19, 15 }
   0xb   : > { %v232_v0 = vld [vmem:[%s916_s1 + $0xf8] sm:$0xff]  ;;  %v231_v2 = vld [vmem:[%s916_s1 + $0xf0] sm:$0xff]  ;;  %v230_v4 = vld [vmem:[%s916_s1 + $0xe8] sm:$0xff]  ;;  %s920_s19 = smov (!%p165_p3, %s557_s19), 15  ;;  %vm244_vm0 = vcmask 261120   ;;  %vm487_vm1 = vcmask 523264  }
   0xc   : > { %v216_v1 = vld [vmem:[%s916_s1 + $0x78] sm:$0xff]  ;;  %572 = vmatprep.subr.mxu0 %v232_v0  ;;  %660 = vmatprep.subr.mxu1 %v232_v0  ;;  %v215_v3 = vld [vmem:[%s916_s1 + $0x70] sm:$0xff]  ;;  %v214_v5 = vld [vmem:[%s916_s1 + $0x68] sm:$0xff]  ;;  %s692_s16 = smul.u32 24, %s920_s19  ;;  %s560_s17 = sshll.u32 %s920_s19, 3 }
   0xd   : > { %573 = vmatpush3.msra.mxu0 %v216_v1  ;;  %676 = vmatpush3.msra.mxu1 %v216_v1  ;;  %v229_v6 = vld [vmem:[%s916_s1 + $0xe0] sm:$0xff]  ;;  %v228_v8 = vld [vmem:[%s916_s1 + $0xd8] sm:$0xff]  ;;  %v227_v10 = vld [vmem:[%s916_s1 + $0xd0] sm:$0xff]  ;;  %s894_s21 = scalar_lea.vmem %s918_s3, %s560_s17 }
   0xe   : > { %574 = vmatprep.subr.mxu0 %v231_v2  ;;  %661 = vmatprep.subr.mxu1 %v231_v2  ;;  %v213_v7 = vld [vmem:[%s916_s1 + $0x60] sm:$0xff]  ;;  %v212_v9 = vld [vmem:[%s916_s1 + $0x58] sm:$0xff]  ;;  %v211_v11 = vld [vmem:[%s916_s1 + $0x50] sm:$0xff]  ;;  %s835_s27 = scalar_lea.vmem %s915_s0, %s692_s16 }
   0xf   : > { %575 = vmatpush3.msra.mxu0 %v215_v3  ;;  %677 = vmatpush3.msra.mxu1 %v215_v3  ;;  %v226_v12 = vld [vmem:[%s916_s1 + $0xc8] sm:$0xff]  ;;  %v225_v14 = vld [vmem:[%s916_s1 + $0xc0] sm:$0xff]  ;;  %v224_v16 = vld [vmem:[%s916_s1 + $0xb8] sm:$0xff] }
  0x10   : > { %576 = vmatprep.subr.mxu0 %v230_v4  ;;  %662 = vmatprep.subr.mxu1 %v230_v4  ;;  %v210_v13 = vld [vmem:[%s916_s1 + $0x48] sm:$0xff]  ;;  %v209_v15 = vld [vmem:[%s916_s1 + $0x40] sm:$0xff]  ;;  %v208_v17 = vld [vmem:[%s916_s1 + $0x38] sm:$0xff] }
  0x11   : > { %577 = vmatpush3.msra.mxu0 %v214_v5  ;;  %678 = vmatpush3.msra.mxu1 %v214_v5  ;;  %v223_v18 = vld [vmem:[%s916_s1 + $0xb0] sm:$0xff]  ;;  %v222_v20 = vld [vmem:[%s916_s1 + $0xa8] sm:$0xff]  ;;  %v221_v22 = vld [vmem:[%s916_s1 + $0xa0] sm:$0xff] }
  0x12   : > { %578 = vmatprep.subr.mxu0 %v229_v6  ;;  %663 = vmatprep.subr.mxu1 %v229_v6  ;;  %v207_v19 = vld [vmem:[%s916_s1 + $0x30] sm:$0xff]  ;;  %v206_v21 = vld [vmem:[%s916_s1 + $0x28] sm:$0xff]  ;;  %v205_v23 = vld [vmem:[%s916_s1 + $0x20] sm:$0xff] }
  0x13   : > { %579 = vmatpush3.msra.mxu0 %v213_v7  ;;  %679 = vmatpush3.msra.mxu1 %v213_v7  ;;  %v220_v24 = vld [vmem:[%s916_s1 + $0x98] sm:$0xff]  ;;  %v219_v26 = vld [vmem:[%s916_s1 + $0x90] sm:$0xff]  ;;  %v218_v28 = vld [vmem:[%s916_s1 + $0x88] sm:$0xff] }
  0x14   : > { %580 = vmatprep.subr.mxu0 %v228_v8  ;;  %664 = vmatprep.subr.mxu1 %v228_v8  ;;  %v204_v25 = vld [vmem:[%s916_s1 + $0x18] sm:$0xff]  ;;  %v203_v27 = vld [vmem:[%s916_s1 + $0x10] sm:$0xff]  ;;  %v202_v29 = vld [vmem:[%s916_s1 + $0x8] sm:$0xff] }
  0x15   : > { %581 = vmatpush3.msra.mxu0 %v212_v9  ;;  %680 = vmatpush3.msra.mxu1 %v212_v9  ;;  %v217_v30 = vld [vmem:[%s916_s1 + $0x80] sm:$0xff]  ;;  %v178_v32 = vld [vmem:[%s835_s27 + $0x8] sm:$0xff]  ;;  %v196_v33 = vld [vmem:[%s835_s27 + $0x98] sm:$0xff] }
  0x16   : > { %582 = vmatprep.subr.mxu0 %v227_v10  ;;  %665 = vmatprep.subr.mxu1 %v227_v10  ;;  %v201_v31 = vld [vmem:[%s916_s1] sm:$0xff]  ;;  %v195_v35 = vld [vmem:[%s835_s27 + $0x90] sm:$0xff]  ;;  %v236_v36 = vld [vmem:[%s916_s1 + $0x118] sm:$0xff] }
  0x17   : > { %583 = vmatpush3.msra.mxu0 %v211_v11  ;;  %681 = vmatpush3.msra.mxu1 %v211_v11  ;;  %v177_v34 = vld [vmem:[%s835_s27] sm:$0xff]  ;;  %v199_v38 = vld [vmem:[%s835_s27 + $0xb0] sm:$0xff]  ;;  %v180_v40 = vld [vmem:[%s835_s27 + $0x18] sm:$0xff] }
  0x18   : > { %584 = vmatprep.subr.mxu0 %v226_v12  ;;  %666 = vmatprep.subr.mxu1 %v226_v12  ;;  %v181_v37 = vld [vmem:[%s835_s27 + $0x20] sm:$0xff]  ;;  %v235_v39 = vld [vmem:[%s916_s1 + $0x110] sm:$0xff]  ;;  %v198_v41 = vld [vmem:[%s835_s27 + $0xa8] sm:$0xff] }
  0x19   : > { %585 = vmatpush3.msra.mxu0 %v210_v13  ;;  %682 = vmatpush3.msra.mxu1 %v210_v13  ;;  %v234_v42 = vld [vmem:[%s916_s1 + $0x108] sm:$0xff]  ;;  %v184_v43 = vld [vmem:[%s835_s27 + $0x38] sm:$0xff]  ;;  %v233_v44 = vld [vmem:[%s916_s1 + $0x100] sm:$0xff] }
  0x1a   : > { %586 = vmatprep.subr.mxu0 %v225_v14  ;;  %667 = vmatprep.subr.mxu1 %v225_v14  ;;  %v179_v45 = vld [vmem:[%s835_s27 + $0x10] sm:$0xff]  ;;  %v182_v47 = vld [vmem:[%s835_s27 + $0x28] sm:$0xff]  ;;  %v185_v49 = vld [vmem:[%s835_s27 + $0x40] sm:$0xff] }
  0x1b   : > { %587 = vmatpush3.msra.mxu0 %v209_v15  ;;  %683 = vmatpush3.msra.mxu1 %v209_v15  ;;  %v183_v46 = vld [vmem:[%s835_s27 + $0x30] sm:$0xff]  ;;  %v186_v50 = vld [vmem:[%s835_s27 + $0x48] sm:$0xff]  ;;  %v188_v51 = vld [vmem:[%s835_s27 + $0x58] sm:$0xff] }
  0x1c   : > { %588 = vmatprep.subr.mxu0 %v224_v16  ;;  %668 = vmatprep.subr.mxu1 %v224_v16  ;;  %v187_v48 = vld [vmem:[%s835_s27 + $0x50] sm:$0xff]  ;;  %v190_v52 = vld [vmem:[%s835_s27 + $0x68] sm:$0xff]  ;;  %v189_v54 = vld [vmem:[%s835_s27 + $0x60] sm:$0xff] }
  0x1d   : > { %589 = vmatpush3.msra.mxu0 %v208_v17  ;;  %684 = vmatpush3.msra.mxu1 %v208_v17  ;;  %v191_v53 = vld [vmem:[%s835_s27 + $0x70] sm:$0xff]  ;;  %v194_v55 = vld [vmem:[%s835_s27 + $0x88] sm:$0xff]  ;;  %v193_v56 = vld [vmem:[%s835_s27 + $0x80] sm:$0xff] }
  0x1e   : > { %590 = vmatprep.subr.mxu0 %v223_v18  ;;  %669 = vmatprep.subr.mxu1 %v223_v18  ;;  %v197_v57 = vld [vmem:[%s835_s27 + $0xa0] sm:$0xff]  ;;  %v192_v58 = vld [vmem:[%s835_s27 + $0x78] sm:$0xff] }
  0x1f   : > { %591 = vmatpush3.msra.mxu0 %v207_v19  ;;  %685 = vmatpush3.msra.mxu1 %v207_v19  ;;  %v200_v59 = vld [vmem:[%s835_s27 + $0xb8] sm:$0xff]  ;;  %v561_v6 = vld [vmem:[%s917_s2] ss:$0 sm:$0xff] }
  0x20   : > { %592 = vmatprep.subr.mxu0 %v222_v20  ;;  %670 = vmatprep.subr.mxu1 %v222_v20 }
  0x21   : > { %593 = vmatpush3.msra.mxu0 %v206_v21  ;;  %686 = vmatpush3.msra.mxu1 %v206_v21 }
  0x22   : > { %594 = vmatprep.subr.mxu0 %v221_v22  ;;  %671 = vmatprep.subr.mxu1 %v221_v22 }
  0x23   : > { %595 = vmatpush3.msra.mxu0 %v205_v23  ;;  %687 = vmatpush3.msra.mxu1 %v205_v23 }
  0x24   : > { %596 = vmatprep.subr.mxu0 %v220_v24  ;;  %672 = vmatprep.subr.mxu1 %v220_v24 }
  0x25   : > { %597 = vmatpush3.msra.mxu0 %v204_v25  ;;  %688 = vmatpush3.msra.mxu1 %v204_v25 }
  0x26   : > { %598 = vmatprep.subr.mxu0 %v219_v26  ;;  %673 = vmatprep.subr.mxu1 %v219_v26 }
  0x27   : > { %599 = vmatpush3.msra.mxu0 %v203_v27  ;;  %689 = vmatpush3.msra.mxu1 %v203_v27 }
  0x28   : > { %600 = vmatprep.subr.mxu0 %v218_v28  ;;  %674 = vmatprep.subr.mxu1 %v218_v28 }
  0x29   : > { %601 = vmatpush3.msra.mxu0 %v202_v29  ;;  %690 = vmatpush3.msra.mxu1 %v202_v29 }
  0x2a   : > { %602 = vmatprep.subr.mxu0 %v217_v30  ;;  %675 = vmatprep.subr.mxu1 %v217_v30 }
  0x2b   : > { %603 = vmatpush3.msra.mxu0 %v201_v31  ;;  %691 = vmatpush3.msra.mxu1 %v201_v31 }
  0x2c   : > { %333 = vmatprep.mubr.f32.mxu0 %v178_v32  ;;  %363 = vmatprep.mubr.f32.mxu1 %v196_v33 }
  0x2d   : > { %334 = vmatmul.mubr.f32.vlgmr.msra.gmra.mxu0 %v177_v34  ;;  %364 = vmatmul.mubr.f32.vlgmr.msra.gmra.mxu1 %v195_v35 }
  0x2e   : > { %640 = vmatprep.subr.mxu1 %v236_v36  ;;  %338 = vmatprep.mubr.f32.mxu0 %v181_v37 }
  0x2f   : > { %641 = vmatpush3.msra.mxu1 %v236_v36  ;;  %368 = vmatprep.mubr.f32.mxu1 %v199_v38 }
  0x30   : > { %642 = vmatprep.subr.mxu1 %v235_v39 }
  0x31   : > { %643 = vmatpush3.msra.mxu1 %v235_v39  ;;  %339 = vmatmul.mubr.f32.gmra.mxu0 %v180_v40 }
  0x32   : > { %369 = vmatmul.mubr.f32.gmra.mxu1 %v198_v41  ;;  %644 = vmatprep.subr.mxu1 %v234_v42 }
  0x33   : > { %645 = vmatpush3.msra.mxu1 %v234_v42  ;;  %343 = vmatprep.mubr.f32.mxu0 %v184_v43 }
  0x34   : > { %646 = vmatprep.subr.mxu1 %v233_v44  ;;  %648 = vmatprep.mubr.msk.f32.mxu1 %vm244_vm0, %v179_v45 }
  0x35   : > { %647 = vmatpush3.msra.mxu1 %v233_v44  ;;  %344 = vmatmul.mubr.f32.gmra.mxu0 %v183_v46 }
  0x36   : > { %649 = vmatmul.mubr.msk.f32.vlgmr.msra.gmra.mxu1 %vm244_vm0, %v182_v47  ;;  %348 = vmatprep.mubr.f32.mxu0 %v187_v48 }
  0x37   : > { %651 = vmatprep.mubr.msk.f32.mxu1 %vm244_vm0, %v185_v49 }
  0x39   : > { %349 = vmatmul.mubr.f32.gmra.mxu0 %v186_v50 }
  0x3a   : > { %652 = vmatmul.mubr.msk.f32.gmra.mxu1 %vm244_vm0, %v188_v51  ;;  %353 = vmatprep.mubr.f32.mxu0 %v190_v52 }
  0x3b   : > { %654 = vmatprep.mubr.msk.f32.mxu1 %vm244_vm0, %v191_v53 }
  0x3d   : > { %354 = vmatmul.mubr.f32.gmra.mxu0 %v189_v54 }
  0x3e   : > { %655 = vmatmul.mubr.msk.f32.gmra.mxu1 %vm244_vm0, %v194_v55  ;;  %358 = vmatprep.mubr.f32.mxu0 %v193_v56 }
  0x3f   : > { %657 = vmatprep.mubr.msk.f32.mxu1 %vm244_vm0, %v197_v57 }
  0x41   : > { %359 = vmatmul.mubr.f32.gmra.mxu0 %v192_v58 }
  0x42   : > { %658 = vmatmul.mubr.msk.f32.gmra.mxu1 %vm244_vm0, %v200_v59 }
  0xed   : > { %v604_v60 = vpop.f32.mrf.mxu0  ;;  %v622_v61 = vpop.f32.mrf.mxu1 }
  0xef   : > { %v605_v62 = vpop.f32.mrf.mxu0  ;;  %v623_v63 = vpop.f32.mrf.mxu1 }
  0xf0   : > { %v606_v2 = vadd.f32 %v605_v62, %v604_v60  ;;  %v624_v29 = vadd.f32 %v623_v63, %v622_v61 }
  0xf1   : > { %v607_v0 = vpop.f32.mrf.mxu0 }
  0xf2   : > { %v625_v1 = vpop.f32.mrf.mxu1  ;;  %v336_v11 = vadd.f32 %v606_v2, %v561_v6  ;;  %v366_v42 = vadd.f32 %v624_v29, %v561_v6 }
  0xf3   : > { %v608_v3 = vpop.f32.mrf.mxu0 }
  0xf4   : > { %v609_v4 = vadd.f32 %v608_v3, %v607_v0  ;;  %v626_v5 = vpop.f32.mrf.mxu1 }
  0xf5   : > { %v610_v7 = vpop.f32.mrf.mxu0  ;;  %v627_v24 = vadd.f32 %v626_v5, %v625_v1 }
  0xf6   : > { %v341_v8 = vadd.f32 %v609_v4, %v561_v6  ;;  %v650_v9 = vpop.f32.mrf.mxu1 }
  0xf7   : > { %v611_v10 = vpop.f32.mrf.mxu0  ;;  %v371_v36 = vadd.f32 %v627_v24, %v561_v6 }
  0xf8   : > { %v446_v12 = vadd.f32 %v650_v9, %v341_v8  ;;  %v612_v13 = vadd.f32 %v611_v10, %v610_v7  ;;  %v440_v14 = vpop.f32.mrf.mxu1 }
  0xf9   : > { %v441_v15 = vadd.f32 %v440_v14, %v336_v11  ;;  %v613_v16 = vpop.f32.mrf.mxu0 }
  0xfa   : > { %v480_v17 = vmax.f32 %v446_v12, 0.0  ;;  %v653_v18 = vpop.f32.mrf.mxu1  ;;  %v346_v19 = vadd.f32 %v612_v13, %v561_v6 }
  0xfb   : > { %v479_v20 = vmax.f32 %v441_v15, 0.0  ;;  %v614_v21 = vpop.f32.mrf.mxu0 }
  0xfc   : > { %489 = vst.msk [vmem:[%s894_s21 + $0x8] sm:$0xff] %vm487_vm1, %v480_v17  ;;  %v615_v22 = vadd.f32 %v614_v21, %v613_v16  ;;  %v450_v23 = vpop.f32.mrf.mxu1 }
  0xfd   : > { %488 = vst.msk [vmem:[%s894_s21] sm:$0xff] %vm487_vm1, %v479_v20  ;;  %v451_v25 = vadd.f32 %v450_v23, %v346_v19  ;;  %v616_v26 = vpop.f32.mrf.mxu0 }
  0xfe   : > { %v351_v27 = vadd.f32 %v615_v22, %v561_v6  ;;  %v656_v28 = vpop.f32.mrf.mxu1 }
  0xff   : > { %v481_v30 = vmax.f32 %v451_v25, 0.0  ;;  %v617_v31 = vpop.f32.mrf.mxu0 }
 0x100   : > { %v456_v32 = vadd.f32 %v653_v18, %v351_v27  ;;  %v618_v33 = vadd.f32 %v617_v31, %v616_v26  ;;  %v460_v34 = vpop.f32.mrf.mxu1 }
 0x101   : > { %490 = vst.msk [vmem:[%s894_s21 + $0x10] sm:$0xff] %vm487_vm1, %v481_v30  ;;  %v619_v35 = vpop.f32.mrf.mxu0 }
 0x102   : > { %v482_v37 = vmax.f32 %v456_v32, 0.0  ;;  %v356_v38 = vadd.f32 %v618_v33, %v561_v6  ;;  %v659_v39 = vpop.f32.mrf.mxu1 }
 0x103   : > { %v476_v40 = vadd.f32 %v659_v39, %v371_v36  ;;  %v620_v41 = vpop.f32.mrf.mxu0 }
 0x104   : > { %491 = vst.msk [vmem:[%s894_s21 + $0x18] sm:$0xff] %vm487_vm1, %v482_v37  ;;  %v461_v43 = vadd.f32 %v460_v34, %v356_v38  ;;  %v621_v44 = vadd.f32 %v620_v41, %v619_v35  ;;  %v470_v45 = vpop.f32.mrf.mxu1 }
 0x105   : > { %v486_v46 = vmax.f32 %v476_v40, 0.0  ;;  %v471_v47 = vadd.f32 %v470_v45, %v366_v42 }
 0x106   : > { %v483_v48 = vmax.f32 %v461_v43, 0.0  ;;  %v361_v49 = vadd.f32 %v621_v44, %v561_v6 }
 0x107   : > { %495 = vst.msk [vmem:[%s894_s21 + $0x38] sm:$0xff] %vm487_vm1, %v486_v46  ;;  %v485_v50 = vmax.f32 %v471_v47, 0.0 }
 0x108   : > { %492 = vst.msk [vmem:[%s894_s21 + $0x20] sm:$0xff] %vm487_vm1, %v483_v48  ;;  %v466_v51 = vadd.f32 %v656_v28, %v361_v49 }
 0x109   : > { %494 = vst.msk [vmem:[%s894_s21 + $0x30] sm:$0xff] %vm487_vm1, %v485_v50 }
 0x10a   : > { %v484_v52 = vmax.f32 %v466_v51, 0.0 }
 0x10c   : > { %493 = vst.msk [vmem:[%s894_s21 + $0x28] sm:$0xff] %vm487_vm1, %v484_v52 }
 0x10d PF: > { %s13_s12 = sadd.s32 1, %s707_s12  }
 0x10e   : > { %p10_p4 = scmp.ge.s32.totalorder %s13_s12, 4  }
 0x110   :  { %12 = sbr.rel (!%p10_p4) target bundleno = 1 (0x1), region = 62 }

// kernel: video_comperator_forward.8
= control target key start
LH: loop header
LB: loop body
LE: loop exit
PB: predicated region body
PF: predicated region fallthrough
CT: control target
= control target key end

     0   :  { %s95_s22 = smov 64   ;;  %vm73_vm0 = vcmask 519168   ;;  %s186_s0 = inlined_call_operand.vmem [shape: f32[8,2,4,128], index: 0, kind: input, shape index: {}]   ;;  %s187_s1 = inlined_call_operand.vmem [shape: f32[8,4,64], index: 1, kind: output, shape index: {}]  }
   0x1   :  { %v10_v0 = vld [vmem:[%s186_s0 + $0x10] sm:$0xf]  ;;  %v88_v1 = vld [vmem:[%s186_s0 + $0x14] sm:$0xf]  ;;  %v8_v2 = vld [vmem:[%s186_s0] sm:$0xf] }
   0x2   :  { %v27_v3 = vmax.f32 %v10_v0, %v88_v1  ;;  %v86_v4 = vld [vmem:[%s186_s0 + $0x4] sm:$0xf]  ;;  %v11_v5 = vld [vmem:[%s186_s0 + $0x18] sm:$0xf]  ;;  %v89_v6 = vld [vmem:[%s186_s0 + $0x1c] sm:$0xf] }
   0x3   :  { %v25_v7 = vmax.f32 %v8_v2, %v86_v4  ;;  %v9_v8 = vld [vmem:[%s186_s0 + $0x8] sm:$0xf]  ;;  %v87_v9 = vld [vmem:[%s186_s0 + $0xc] sm:$0xf]  ;;  %v28_v10 = vmax.f32 %v11_v5, %v89_v6  ;;  %v12_v14 = vld [vmem:[%s186_s0 + $0x20] sm:$0xf] }
   0x4   :  { %45 = vrot.lane.b32.xlu1 %v27_v3, %s95_s22  ;;  %v26_v11 = vmax.f32 %v9_v8, %v87_v9  ;;  %v13_v12 = vld [vmem:[%s186_s0 + $0x28] sm:$0xf]  ;;  %v91_v13 = vld [vmem:[%s186_s0 + $0x2c] sm:$0xf]  ;;  %v90_v15 = vld [vmem:[%s186_s0 + $0x24] sm:$0xf] }
   0x5   :  { %41 = vrot.lane.b32.xlu0 %v25_v7, %s95_s22  ;;  %v30_v16 = vmax.f32 %v13_v12, %v91_v13  ;;  %v29_v17 = vmax.f32 %v12_v14, %v90_v15  ;;  %v15_v18 = vld [vmem:[%s186_s0 + $0x38] sm:$0xf]  ;;  %v93_v19 = vld [vmem:[%s186_s0 + $0x3c] sm:$0xf]  ;;  %v14_v20 = vld [vmem:[%s186_s0 + $0x30] sm:$0xf] }
   0x6   :  { %v92_v21 = vld [vmem:[%s186_s0 + $0x34] sm:$0xf]  ;;  %v32_v22 = vmax.f32 %v15_v18, %v93_v19 }
   0x7   :  { %v31_v23 = vmax.f32 %v14_v20, %v92_v21 }
   0x8   :  { %47 = vrot.lane.b32.xlu1 %v28_v10, %s95_s22 }
   0x9   :  { %43 = vrot.lane.b32.xlu0 %v26_v11, %s95_s22 }
   0xc   :  { %51 = vrot.lane.b32.xlu1 %v30_v16, %s95_s22 }
   0xd   :  { %49 = vrot.lane.b32.xlu0 %v29_v17, %s95_s22 }
  0x10   :  { %55 = vrot.lane.b32.xlu1 %v32_v22, %s95_s22 }
  0x11   :  { %53 = vrot.lane.b32.xlu0 %v31_v23, %s95_s22 }
  0x76   :  { %v46_v24 = vpop.permute.xlu1 %45 }
  0x77   :  { %v67_v25 = vmax.f32 %v27_v3, %v46_v24  ;;  %v42_v26 = vpop.permute.xlu0 %41 }
  0x78   :  { %v65_v27 = vmax.f32 %v25_v7, %v42_v26 }
  0x79   :  { %76 = vst.msk [vmem:[%s187_s1 + $0x8] sm:$0xf] %vm73_vm0, %v67_v25 }
  0x7a   :  { %74 = vst.msk [vmem:[%s187_s1] sm:$0xf] %vm73_vm0, %v65_v27  ;;  %v48_v28 = vpop.permute.xlu1 %47 }
  0x7b   :  { %v68_v29 = vmax.f32 %v28_v10, %v48_v28  ;;  %v44_v30 = vpop.permute.xlu0 %43 }
  0x7c   :  { %v66_v31 = vmax.f32 %v26_v11, %v44_v30 }
  0x7d   :  { %77 = vst.msk [vmem:[%s187_s1 + $0xc] sm:$0xf] %vm73_vm0, %v68_v29 }
  0x7e   :  { %75 = vst.msk [vmem:[%s187_s1 + $0x4] sm:$0xf] %vm73_vm0, %v66_v31  ;;  %v52_v32 = vpop.permute.xlu1 %51 }
  0x7f   :  { %v70_v33 = vmax.f32 %v30_v16, %v52_v32  ;;  %v50_v34 = vpop.permute.xlu0 %49 }
  0x80   :  { %v69_v35 = vmax.f32 %v29_v17, %v50_v34 }
  0x81   :  { %79 = vst.msk [vmem:[%s187_s1 + $0x14] sm:$0xf] %vm73_vm0, %v70_v33 }
  0x82   :  { %78 = vst.msk [vmem:[%s187_s1 + $0x10] sm:$0xf] %vm73_vm0, %v69_v35  ;;  %v56_v36 = vpop.permute.xlu1 %55 }
  0x83   :  { %v72_v37 = vmax.f32 %v32_v22, %v56_v36  ;;  %v54_v38 = vpop.permute.xlu0 %53 }
  0x84   :  { %v71_v39 = vmax.f32 %v31_v23, %v54_v38 }
  0x85   :  { %81 = vst.msk [vmem:[%s187_s1 + $0x1c] sm:$0xf] %vm73_vm0, %v72_v37 }
  0x86   :  { %80 = vst.msk [vmem:[%s187_s1 + $0x18] sm:$0xf] %vm73_vm0, %v71_v39 }

// kernel: video_comperator_forward.9
= control target key start
LH: loop header
LB: loop body
LE: loop exit
PB: predicated region body
PF: predicated region fallthrough
CT: control target
= control target key end

     0   :  { %s936_s20 = smov 0   ;;  %s1246_s0 = inlined_call_operand.vmem [shape: f32[32,576], index: 0, kind: input, shape index: {}]   ;;  %s1247_s1 = inlined_call_operand.vmem [shape: f32[576,128], index: 1, kind: input, shape index: {}]   ;;  %s1248_s2 = inlined_call_operand.vmem [shape: f32[1,128], index: 2, kind: input, shape index: {}]   ;;  %s1249_s3 = inlined_call_operand.vmem [shape: f32[128,1], index: 3, kind: input, shape index: {}]   ;;  %s1250_s4 = inlined_call_operand.<no memory space> [shape: f32[1,1], index: 4, kind: input, shape index: {}]   ;;  %s1251_s5 = inlined_call_operand.vmem [shape: f32[32,1], index: 5, kind: output, shape index: {}]  }
   0x1   :  { %v10_v0 = vstv %s1250_s4 }
   0x2   :  { %11 = vst [vmem:[#allocation2] sm:$0x1] %v10_v0 }
   0x3 LB: > { %s713_s21 = sadd.s32 4294967295, %s901_s20   ;;  %p717_p0 = scmp.ge.s32.totalorder %s901_s20, 1  ;;  %s901_s20 = sphi %s936_s20, %s17_s20  }
   0x4   : > { %p191_p1 = scmp.lt.s32.totalorder %s901_s20, 3 }
   0x6   : > { %p192_p2 = pnand %p717_p0, %p191_p1 }
   0x7   : > { %s1021_s4 = sshll.u32 (!%p192_p2), %s713_s21, 1 }
   0x8   : > { %195 = sbr.rel (%p192_p2) target bundleno = 462 (0x1ce), region = 40  ;;  %p221_p3 = scmp.lt.s32.totalorder (!%p192_p2), %s1021_s4, 3 }
   0xd   : > { %v274_v1 = vld [vmem:[%s1247_s1 + $0xf8] sm:$0xff]  ;;  %v273_v3 = vld [vmem:[%s1247_s1 + $0xf0] sm:$0xff]  ;;  %v272_v7 = vld [vmem:[%s1247_s1 + $0xe8] sm:$0xff]  ;;  %s1253_s4 = smov (!%p221_p3, %s1021_s4), 3  ;;  %vm322_vm0 = vcmask 523264   ;;  %vm654_vm1 = vcmask 7168  }
   0xe   : > { %v258_v2 = vld [vmem:[%s1247_s1 + $0x78] sm:$0xff]  ;;  %728 = vmatprep.subr.mxu0 %v274_v1  ;;  %v257_v5 = vld [vmem:[%s1247_s1 + $0x70] sm:$0xff]  ;;  %v256_v9 = vld [vmem:[%s1247_s1 + $0x68] sm:$0xff]  ;;  %s886_s18 = smul.u32 40, %s1253_s4  ;;  %s721_s11 = sshll.u32 %s1253_s4, 3 }
   0xf   : > { %v306_v4 = vld [vmem:[%s1247_s1 + $0x1f8] sm:$0xff]  ;;  %729 = vmatpush3.msra.mxu0 %v258_v2  ;;  %v305_v8 = vld [vmem:[%s1247_s1 + $0x1f0] sm:$0xff]  ;;  %v304_v11 = vld [vmem:[%s1247_s1 + $0x1e8] sm:$0xff]  ;;  %s231_s14 = scalar_lea.vmem %s1251_s5, %s721_s11 }
  0x10   : > { %v290_v6 = vld [vmem:[%s1247_s1 + $0x178] sm:$0xff]  ;;  %766 = vmatprep.subr.mxu1 %v306_v4  ;;  %730 = vmatprep.subr.mxu0 %v273_v3  ;;  %v289_v10 = vld [vmem:[%s1247_s1 + $0x170] sm:$0xff]  ;;  %v271_v12 = vld [vmem:[%s1247_s1 + $0xe0] sm:$0xff]  ;;  %s1123_s13 = scalar_lea.vmem %s1246_s0, %s886_s18 }
  0x11   : > { %767 = vmatpush3.msra.mxu1 %v290_v6  ;;  %731 = vmatpush3.msra.mxu0 %v257_v5  ;;  %v288_v13 = vld [vmem:[%s1247_s1 + $0x168] sm:$0xff]  ;;  %v255_v14 = vld [vmem:[%s1247_s1 + $0x60] sm:$0xff]  ;;  %v270_v16 = vld [vmem:[%s1247_s1 + $0xd8] sm:$0xff] }
  0x12   : > { %768 = vmatprep.subr.mxu1 %v305_v8  ;;  %732 = vmatprep.subr.mxu0 %v272_v7  ;;  %v303_v15 = vld [vmem:[%s1247_s1 + $0x1e0] sm:$0xff]  ;;  %v254_v18 = vld [vmem:[%s1247_s1 + $0x58] sm:$0xff]  ;;  %v269_v20 = vld [vmem:[%s1247_s1 + $0xd0] sm:$0xff] }
  0x13   : > { %769 = vmatpush3.msra.mxu1 %v289_v10  ;;  %733 = vmatpush3.msra.mxu0 %v256_v9  ;;  %v287_v17 = vld [vmem:[%s1247_s1 + $0x160] sm:$0xff]  ;;  %v302_v19 = vld [vmem:[%s1247_s1 + $0x1d8] sm:$0xff]  ;;  %v253_v22 = vld [vmem:[%s1247_s1 + $0x50] sm:$0xff] }
  0x14   : > { %770 = vmatprep.subr.mxu1 %v304_v11  ;;  %734 = vmatprep.subr.mxu0 %v271_v12  ;;  %v286_v21 = vld [vmem:[%s1247_s1 + $0x158] sm:$0xff]  ;;  %v301_v23 = vld [vmem:[%s1247_s1 + $0x1d0] sm:$0xff]  ;;  %v268_v24 = vld [vmem:[%s1247_s1 + $0xc8] sm:$0xff] }
  0x15   : > { %771 = vmatpush3.msra.mxu1 %v288_v13  ;;  %735 = vmatpush3.msra.mxu0 %v255_v14  ;;  %v285_v25 = vld [vmem:[%s1247_s1 + $0x150] sm:$0xff]  ;;  %v252_v26 = vld [vmem:[%s1247_s1 + $0x48] sm:$0xff]  ;;  %v267_v28 = vld [vmem:[%s1247_s1 + $0xc0] sm:$0xff] }
  0x16   : > { %772 = vmatprep.subr.mxu1 %v303_v15  ;;  %736 = vmatprep.subr.mxu0 %v270_v16  ;;  %v300_v27 = vld [vmem:[%s1247_s1 + $0x1c8] sm:$0xff]  ;;  %v251_v30 = vld [vmem:[%s1247_s1 + $0x40] sm:$0xff]  ;;  %v266_v32 = vld [vmem:[%s1247_s1 + $0xb8] sm:$0xff] }
  0x17   : > { %773 = vmatpush3.msra.mxu1 %v287_v17  ;;  %737 = vmatpush3.msra.mxu0 %v254_v18  ;;  %v284_v29 = vld [vmem:[%s1247_s1 + $0x148] sm:$0xff]  ;;  %v299_v31 = vld [vmem:[%s1247_s1 + $0x1c0] sm:$0xff]  ;;  %v250_v34 = vld [vmem:[%s1247_s1 + $0x38] sm:$0xff] }
  0x18   : > { %774 = vmatprep.subr.mxu1 %v302_v19  ;;  %738 = vmatprep.subr.mxu0 %v269_v20  ;;  %v283_v33 = vld [vmem:[%s1247_s1 + $0x140] sm:$0xff]  ;;  %v298_v35 = vld [vmem:[%s1247_s1 + $0x1b8] sm:$0xff]  ;;  %v265_v36 = vld [vmem:[%s1247_s1 + $0xb0] sm:$0xff] }
  0x19   : > { %775 = vmatpush3.msra.mxu1 %v286_v21  ;;  %739 = vmatpush3.msra.mxu0 %v253_v22  ;;  %v282_v37 = vld [vmem:[%s1247_s1 + $0x138] sm:$0xff]  ;;  %v249_v38 = vld [vmem:[%s1247_s1 + $0x30] sm:$0xff]  ;;  %v264_v40 = vld [vmem:[%s1247_s1 + $0xa8] sm:$0xff] }
  0x1a   : > { %776 = vmatprep.subr.mxu1 %v301_v23  ;;  %740 = vmatprep.subr.mxu0 %v268_v24  ;;  %v297_v39 = vld [vmem:[%s1247_s1 + $0x1b0] sm:$0xff]  ;;  %v248_v42 = vld [vmem:[%s1247_s1 + $0x28] sm:$0xff]  ;;  %v263_v44 = vld [vmem:[%s1247_s1 + $0xa0] sm:$0xff] }
  0x1b   : > { %777 = vmatpush3.msra.mxu1 %v285_v25  ;;  %741 = vmatpush3.msra.mxu0 %v252_v26  ;;  %v281_v41 = vld [vmem:[%s1247_s1 + $0x130] sm:$0xff]  ;;  %v296_v43 = vld [vmem:[%s1247_s1 + $0x1a8] sm:$0xff]  ;;  %v247_v46 = vld [vmem:[%s1247_s1 + $0x20] sm:$0xff] }
  0x1c   : > { %778 = vmatprep.subr.mxu1 %v300_v27  ;;  %742 = vmatprep.subr.mxu0 %v267_v28  ;;  %v280_v45 = vld [vmem:[%s1247_s1 + $0x128] sm:$0xff]  ;;  %v295_v47 = vld [vmem:[%s1247_s1 + $0x1a0] sm:$0xff]  ;;  %v262_v48 = vld [vmem:[%s1247_s1 + $0x98] sm:$0xff] }
  0x1d   : > { %779 = vmatpush3.msra.mxu1 %v284_v29  ;;  %743 = vmatpush3.msra.mxu0 %v251_v30  ;;  %v279_v49 = vld [vmem:[%s1247_s1 + $0x120] sm:$0xff]  ;;  %v246_v50 = vld [vmem:[%s1247_s1 + $0x18] sm:$0xff]  ;;  %v261_v52 = vld [vmem:[%s1247_s1 + $0x90] sm:$0xff] }
  0x1e   : > { %780 = vmatprep.subr.mxu1 %v299_v31  ;;  %744 = vmatprep.subr.mxu0 %v266_v32  ;;  %v294_v51 = vld [vmem:[%s1247_s1 + $0x198] sm:$0xff]  ;;  %v245_v54 = vld [vmem:[%s1247_s1 + $0x10] sm:$0xff]  ;;  %v260_v56 = vld [vmem:[%s1247_s1 + $0x88] sm:$0xff] }
  0x1f   : > { %781 = vmatpush3.msra.mxu1 %v283_v33  ;;  %745 = vmatpush3.msra.mxu0 %v250_v34  ;;  %v278_v53 = vld [vmem:[%s1247_s1 + $0x118] sm:$0xff]  ;;  %v293_v55 = vld [vmem:[%s1247_s1 + $0x190] sm:$0xff]  ;;  %v244_v58 = vld [vmem:[%s1247_s1 + $0x8] sm:$0xff] }
  0x20   : > { %782 = vmatprep.subr.mxu1 %v298_v35  ;;  %746 = vmatprep.subr.mxu0 %v265_v36  ;;  %v277_v57 = vld [vmem:[%s1247_s1 + $0x110] sm:$0xff]  ;;  %v292_v59 = vld [vmem:[%s1247_s1 + $0x188] sm:$0xff]  ;;  %v259_v60 = vld [vmem:[%s1247_s1 + $0x80] sm:$0xff] }
  0x21   : > { %783 = vmatpush3.msra.mxu1 %v282_v37  ;;  %747 = vmatpush3.msra.mxu0 %v249_v38  ;;  %v234_v61 = vld [vmem:[%s1123_s13 + $0x8] sm:$0xff]  ;;  %v243_v62 = vld [vmem:[%s1247_s1] sm:$0xff]  ;;  %v314_v2 = vld [vmem:[%s1247_s1 + $0x238] sm:$0xff] }
  0x22   : > { %784 = vmatprep.subr.mxu1 %v297_v39  ;;  %748 = vmatprep.subr.mxu0 %v264_v40  ;;  %v276_v63 = vld [vmem:[%s1247_s1 + $0x108] sm:$0xff]  ;;  %v233_v0 = vld [vmem:[%s1123_s13] sm:$0xff]  ;;  %v236_v4 = vld [vmem:[%s1123_s13 + $0x18] sm:$0xff] }
  0x23   : > { %785 = vmatpush3.msra.mxu1 %v281_v41  ;;  %749 = vmatpush3.msra.mxu0 %v248_v42  ;;  %v291_v1 = vld [vmem:[%s1247_s1 + $0x180] sm:$0xff]  ;;  %v235_v5 = vld [vmem:[%s1123_s13 + $0x10] sm:$0xff]  ;;  %v312_v8 = vld [vmem:[%s1247_s1 + $0x228] sm:$0xff] }
  0x24   : > { %786 = vmatprep.subr.mxu1 %v296_v43  ;;  %750 = vmatprep.subr.mxu0 %v263_v44  ;;  %v275_v3 = vld [vmem:[%s1247_s1 + $0x100] sm:$0xff]  ;;  %v313_v6 = vld [vmem:[%s1247_s1 + $0x230] sm:$0xff]  ;;  %v238_v9 = vld [vmem:[%s1123_s13 + $0x28] sm:$0xff] }
  0x25   : > { %787 = vmatpush3.msra.mxu1 %v280_v45  ;;  %751 = vmatpush3.msra.mxu0 %v247_v46  ;;  %v239_v7 = vld [vmem:[%s1123_s13 + $0x30] sm:$0xff]  ;;  %v241_v10 = vld [vmem:[%s1123_s13 + $0x40] sm:$0xff]  ;;  %v240_v12 = vld [vmem:[%s1123_s13 + $0x38] sm:$0xff] }
  0x26   : > { %788 = vmatprep.subr.mxu1 %v295_v47  ;;  %752 = vmatprep.subr.mxu0 %v262_v48  ;;  %v311_v11 = vld [vmem:[%s1247_s1 + $0x220] sm:$0xff]  ;;  %v310_v14 = vld [vmem:[%s1247_s1 + $0x218] sm:$0xff]  ;;  %v309_v16 = vld [vmem:[%s1247_s1 + $0x210] sm:$0xff] }
  0x27   : > { %789 = vmatpush3.msra.mxu1 %v279_v49  ;;  %753 = vmatpush3.msra.mxu0 %v246_v50  ;;  %v237_v13 = vld [vmem:[%s1123_s13 + $0x20] sm:$0xff]  ;;  %v571_v15 = vld [vmem:[%s1249_s3 + $0x78] sm:$0xff]  ;;  %v570_v17 = vld [vmem:[%s1249_s3 + $0x70] sm:$0xff] }
  0x28   : > { %790 = vmatprep.subr.mxu1 %v294_v51  ;;  %754 = vmatprep.subr.mxu0 %v261_v52  ;;  %v308_v18 = vld [vmem:[%s1247_s1 + $0x208] sm:$0xff]  ;;  %v307_v20 = vld [vmem:[%s1247_s1 + $0x200] sm:$0xff]  ;;  %v567_v23 = vld [vmem:[%s1249_s3 + $0x58] sm:$0xff] }
  0x29   : > { %791 = vmatpush3.msra.mxu1 %v278_v53  ;;  %755 = vmatpush3.msra.mxu0 %v245_v54  ;;  %v569_v19 = vld [vmem:[%s1249_s3 + $0x68] sm:$0xff]  ;;  %v568_v21 = vld [vmem:[%s1249_s3 + $0x60] sm:$0xff]  ;;  %v566_v24 = vld [vmem:[%s1249_s3 + $0x50] sm:$0xff] }
  0x2a   : > { %792 = vmatprep.subr.mxu1 %v293_v55  ;;  %756 = vmatprep.subr.mxu0 %v260_v56  ;;  %v242_v22 = vld [vmem:[%s1123_s13 + $0x48] sm:$0xff]  ;;  %v564_v26 = vld [vmem:[%s1249_s3 + $0x40] sm:$0xff]  ;;  %v563_v27 = vld [vmem:[%s1249_s3 + $0x38] sm:$0xff] }
  0x2b   : > { %793 = vmatpush3.msra.mxu1 %v277_v57  ;;  %757 = vmatpush3.msra.mxu0 %v244_v58  ;;  %v565_v25 = vld [vmem:[%s1249_s3 + $0x48] sm:$0xff]  ;;  %v562_v28 = vld [vmem:[%s1249_s3 + $0x30] sm:$0xff]  ;;  %v560_v30 = vld [vmem:[%s1249_s3 + $0x20] sm:$0xff] }
  0x2c   : > { %794 = vmatprep.subr.mxu1 %v292_v59  ;;  %758 = vmatprep.subr.mxu0 %v259_v60  ;;  %v561_v29 = vld [vmem:[%s1249_s3 + $0x28] sm:$0xff]  ;;  %v559_v31 = vld [vmem:[%s1249_s3 + $0x18] sm:$0xff]  ;;  %v558_v32 = vld [vmem:[%s1249_s3 + $0x10] sm:$0xff] }
  0x2d   : > { %393 = vmatprep.mubr.f32.mxu0 %v234_v61  ;;  %759 = vmatpush3.msra.mxu0 %v243_v62  ;;  %v557_v33 = vld [vmem:[%s1249_s3 + $0x8] sm:$0xff]  ;;  %v556_v34 = vld [vmem:[%s1249_s3] sm:$0xff] }
  0x2e   : > { %795 = vmatpush3.msra.mxu1 %v276_v63  ;;  %394 = vmatmul.mubr.f32.vlgmr.msra.gmra.mxu0 %v233_v0  ;;  %v722_v44 = vld [vmem:[%s1248_s2] ss:$0 sm:$0xff] }
  0x2f   : > { %796 = vmatprep.subr.mxu1 %v291_v1  ;;  %832 = vmatprep.subr.mxu0 %v314_v2  ;;  %v725_v59 = vld [vmem:[#allocation2] ss:$0 sm:$0xff] }
  0x30   : > { %797 = vmatpush3.msra.mxu1 %v275_v3  ;;  %468 = vmatprep.mubr.f32.mxu1 %v236_v4 }
  0x31   : > { %833 = vmatpush3.msra.mxu0 %v314_v2  ;;  %469 = vmatmul.mubr.f32.vlgmr.msra.gmra.mxu1 %v235_v5 }
  0x32   : > { %834 = vmatprep.subr.mxu0 %v313_v6  ;;  %398 = vmatprep.mubr.f32.mxu0 %v239_v7 }
  0x33   : > { %835 = vmatpush3.msra.mxu0 %v313_v6  ;;  %473 = vmatprep.mubr.f32.mxu1 %v241_v10 }
  0x34   : > { %836 = vmatprep.subr.mxu0 %v312_v8  ;;  %399 = vmatmul.mubr.f32.gmra.mxu0 %v238_v9 }
  0x35   : > { %837 = vmatpush3.msra.mxu0 %v312_v8  ;;  %474 = vmatmul.mubr.f32.gmra.mxu1 %v240_v12 }
  0x36   : > { %838 = vmatprep.subr.mxu0 %v311_v11  ;;  %848 = vmatprep.mubr.msk.f32.mxu0 %vm322_vm0, %v237_v13 }
  0x37   : > { %839 = vmatpush3.msra.mxu0 %v311_v11  ;;  %851 = vmatprep.subr.mxu1 %v571_v15 }
  0x38   : > { %840 = vmatprep.subr.mxu0 %v310_v14  ;;  %852 = vmatpush3.msra.mxu1 %v571_v15 }
  0x39   : > { %841 = vmatpush3.msra.mxu0 %v310_v14  ;;  %853 = vmatprep.subr.mxu1 %v570_v17 }
  0x3a   : > { %842 = vmatprep.subr.mxu0 %v309_v16  ;;  %854 = vmatpush3.msra.mxu1 %v570_v17 }
  0x3b   : > { %843 = vmatpush3.msra.mxu0 %v309_v16  ;;  %855 = vmatprep.subr.mxu1 %v569_v19 }
  0x3c   : > { %844 = vmatprep.subr.mxu0 %v308_v18  ;;  %856 = vmatpush3.msra.mxu1 %v569_v19 }
  0x3d   : > { %845 = vmatpush3.msra.mxu0 %v308_v18  ;;  %857 = vmatprep.subr.mxu1 %v568_v21 }
  0x3e   : > { %846 = vmatprep.subr.mxu0 %v307_v20  ;;  %858 = vmatpush3.msra.mxu1 %v568_v21 }
  0x3f   : > { %847 = vmatpush3.msra.mxu0 %v307_v20  ;;  %859 = vmatprep.subr.mxu1 %v567_v23 }
  0x40   : > { %849 = vmatmul.mubr.msk.f32.vlgmr.msra.gmra.mxu0 %vm322_vm0, %v242_v22  ;;  %860 = vmatpush3.msra.mxu1 %v567_v23 }
  0x41   : > { %861 = vmatprep.subr.mxu1 %v566_v24 }
  0x42   : > { %862 = vmatpush3.msra.mxu1 %v566_v24 }
  0x43   : > { %863 = vmatprep.subr.mxu1 %v565_v25 }
  0x44   : > { %864 = vmatpush3.msra.mxu1 %v565_v25 }
  0x45   : > { %865 = vmatprep.subr.mxu1 %v564_v26 }
  0x46   : > { %866 = vmatpush3.msra.mxu1 %v564_v26 }
  0x47   : > { %867 = vmatprep.subr.mxu1 %v563_v27 }
  0x48   : > { %868 = vmatpush3.msra.mxu1 %v563_v27 }
  0x49   : > { %869 = vmatprep.subr.mxu1 %v562_v28 }
  0x4a   : > { %870 = vmatpush3.msra.mxu1 %v562_v28 }
  0x4b   : > { %871 = vmatprep.subr.mxu1 %v561_v29 }
  0x4c   : > { %872 = vmatpush3.msra.mxu1 %v561_v29 }
  0x4d   : > { %873 = vmatprep.subr.mxu1 %v560_v30 }
  0x4e   : > { %874 = vmatpush3.msra.mxu1 %v560_v30 }
  0x4f   : > { %875 = vmatprep.subr.mxu1 %v559_v31 }
  0x50   : > { %876 = vmatpush3.msra.mxu1 %v559_v31 }
  0x51   : > { %877 = vmatprep.subr.mxu1 %v558_v32 }
  0x52   : > { %878 = vmatpush3.msra.mxu1 %v558_v32 }
  0x53   : > { %879 = vmatprep.subr.mxu1 %v557_v33 }
  0x54   : > { %880 = vmatpush3.msra.mxu1 %v557_v33 }
  0x55   : > { %881 = vmatprep.subr.mxu1 %v556_v34 }
  0x56   : > { %882 = vmatpush3.msra.mxu1 %v556_v34 }
  0xee   : > { %v760_v35 = vpop.f32.mrf.mxu0 }
  0xf0   : > { %v761_v36 = vpop.f32.mrf.mxu0 }
  0xf1   : > { %v798_v37 = vpop.f32.mrf.mxu1  ;;  %v762_v45 = vadd.f32 %v761_v36, %v760_v35 }
  0xf3   : > { %v799_v38 = vpop.f32.mrf.mxu1  ;;  %v396_v48 = vadd.f32 %v762_v45, %v722_v44 }
  0xf4   : > { %v763_v39 = vpop.f32.mrf.mxu0  ;;  %v800_v49 = vadd.f32 %v799_v38, %v798_v37 }
  0xf5   : > { %v801_v41 = vpop.f32.mrf.mxu1 }
  0xf6   : > { %v764_v40 = vpop.f32.mrf.mxu0  ;;  %v471_v52 = vadd.f32 %v800_v49, %v396_v48 }
  0xf7   : > { %v765_v42 = vadd.f32 %v764_v40, %v763_v39  ;;  %v802_v43 = vpop.f32.mrf.mxu1 }
  0xf8   : > { %v803_v47 = vadd.f32 %v802_v43, %v801_v41 }
  0xf9   : > { %v401_v46 = vadd.f32 %v765_v42, %v722_v44 }
  0xfb   : > { %v476_v50 = vadd.f32 %v803_v47, %v401_v46 }
 0x100   : > { %v850_v51 = vpop.f32.mrf.mxu0 }
 0x101   : > { %v551_v53 = vadd.f32 %v850_v51, %v476_v50 }
 0x102   : > { %v545_v54 = vpop.f32.mrf.mxu0 }
 0x103   : > { %v546_v55 = vadd.f32 %v545_v54, %v471_v52  ;;  %v555_v57 = vmax.f32 %v551_v53, 0.0 }
 0x105   : > { %v554_v56 = vmax.f32 %v546_v55, 0.0 }
 0x107   : > { %883 = vmatprep.mubr.f32.mxu1 %v554_v56 }
 0x108   : > { %884 = vmatmul.mubr.f32.vlgmr.msra.gmra.mxu1 %v555_v57 }
 0x1c8   : > { %v885_v58 = vpop.f32.mrf.mxu1 }
 0x1c9   : > { %v651_v62 = vadd.f32 %v885_v58, %v725_v59 }
 0x1ca   : > { %v645_v60 = vpop.f32.mrf.mxu1 }
 0x1cb   : > { %v646_v61 = vadd.f32 %v725_v59, %v645_v60  ;;  %656 = vst.msk [vmem:[%s231_s14 + $0x8] sm:$0xff] %vm654_vm1, %v651_v62 }
 0x1cd   : > { %655 = vst.msk [vmem:[%s231_s14] sm:$0xff] %vm654_vm1, %v646_v61 }
 0x1ce PF: > { %s17_s20 = sadd.s32 1, %s901_s20  }
 0x1cf   : > { %p14_p4 = scmp.ge.s32.totalorder %s17_s20, 4  }
 0x1d1   :  { %16 = sbr.rel (!%p14_p4) target bundleno = 3 (0x3), region = 70 }

</bundles_post_ra>
